<compile_context>
chip_gen: v7x
topology: tpu7x:2x2x1
jax: 0.10.0
libtpu: 0.0.40
codegen_flags: <defaults>
</compile_context>

<pallas_src>
import math

import jax
import jax.numpy as jnp
import numpy as np
from jax.experimental import pallas as pl
from jax.experimental.pallas import tpu as pltpu

D_MODEL = 128
NUM_HEADS = 2
HEAD_DIM = D_MODEL // NUM_HEADS


def _cond_embedder_kernel(idx_ref, qkvw_ref, qkvb_ref, outw_ref, outb_ref,
                          scorew_ref, linw_ref, linb_ref, o_ref):
    D, HD, H = D_MODEL, HEAD_DIM, NUM_HEADS
    TB = o_ref.shape[0]                 # batch rows in this tile
    AT = idx_ref.shape[0]               # attr_dim * TB (attribute-major stacked)
    A = AT // TB                         # attr_dim
    Vp = qkvw_ref.shape[0]               # padded one-hot width

    # ---- fused gather + mask + scaled QKV projection (one matmul) ----------
    # masked / padded rows carry id == -1 -> all-zero one-hot row -> bias only.
    iota_v = jax.lax.broadcasted_iota(jnp.int32, (1, Vp), 1)
    onehot = (idx_ref[...] == iota_v).astype(jnp.bfloat16)             # (A*TB, Vp)
    qkv = jnp.dot(onehot, qkvw_ref[...],
                  preferred_element_type=jnp.float32) + qkvb_ref[...]  # (A*TB, 3D)

    q = [qkv[a * TB:(a + 1) * TB, 0:D] for a in range(A)]              # pre-scaled q
    k = [qkv[a * TB:(a + 1) * TB, D:2 * D] for a in range(A)]
    v = [qkv[a * TB:(a + 1) * TB, 2 * D:3 * D] for a in range(A)]

    # ---- 2-head self-attention over the A attributes -----------------------
    # Scores on the MXU: lane-concat the q_i * k_j products (128-aligned) and
    # reduce them with a constant block-ones matrix (scores land in lanes
    # h*A + j).  Softmax stays f32 on VPU/EUP; 1/sqrt(HD) already folded.
    w_score = scorew_ref[...]                                           # (A*D, 128) bf16
    heads = [[None] * A for _ in range(H)]                              # heads[h][i]: (TB, HD)
    for i in range(A):
        prod = jnp.concatenate([q[i] * k[j] for j in range(A)], axis=1)  # (TB, A*D)
        s_all = jnp.dot(prod.astype(jnp.bfloat16), w_score,
                        preferred_element_type=jnp.float32)             # (TB, 128)
        for h in range(H):
            s = s_all[:, h * A:(h + 1) * A]                             # (TB, A)
            m = jnp.max(s, axis=1, keepdims=True)
            e = jnp.exp(s - m)                                          # (TB, A)
            inv = pl.reciprocal(jnp.sum(e, axis=1, keepdims=True), approx=True)
            o = e[:, 0:1] * v[0][:, h * HD:(h + 1) * HD]
            for j in range(1, A):
                o = o + e[:, j:j + 1] * v[j][:, h * HD:(h + 1) * HD]
            heads[h][i] = o * inv                                       # (TB, HD)

    # ---- out_proj: one matmul per head over sublane-stacked attributes -----
    w_out = outw_ref[...]                                               # (D, D)
    attn_h = jnp.concatenate(heads[0], axis=0)                          # (A*TB, HD)
    proj = jnp.dot(attn_h.astype(jnp.bfloat16), w_out[0:HD, :],
                   preferred_element_type=jnp.float32)
    for h in range(1, H):
        attn_h = jnp.concatenate(heads[h], axis=0)
        proj = proj + jnp.dot(attn_h.astype(jnp.bfloat16),
                              w_out[h * HD:(h + 1) * HD, :],
                              preferred_element_type=jnp.float32)
    proj = proj + outb_ref[...]                                         # (A*TB, D)

    # ---- final linear: one K = A*D matmul -----------------------------------
    proj_cat = jnp.concatenate(
        [proj[a * TB:(a + 1) * TB, :] for a in range(A)], axis=1)       # (TB, A*D)
    out = jnp.dot(proj_cat.astype(jnp.bfloat16), linw_ref[...],
                  preferred_element_type=jnp.float32) + linb_ref[...]
    o_ref[...] = out.astype(o_ref.dtype)                                # (TB, Hp) lane-dense


def _pick_batch_tile(B):
    """Batch rows per grid step: multiple of 16 (bf16 sublane tile), as large as
    VMEM comfortably allows (<= 512), while keeping >= 2 grid steps when the
    batch permits so a 'parallel' grid can be sharded across v7x's 2 TCs."""
    Bp16 = ((max(B, 1) + 15) // 16) * 16
    if Bp16 <= 32:
        return Bp16
    return max(16, min(512, ((Bp16 // 2) // 16) * 16))


def discrete_cond_embedder(attr, mask, params, num_bins):
    """attr: (B, attr_dim) int32 in [0, num_bins); mask: (B, attr_dim) or None."""
    emb_table = params["embedding"]                      # (attr_dim*num_bins, 128)
    in_w, in_b = params["in_proj_weight"], params["in_proj_bias"]
    out_w, out_b = params["out_proj_weight"], params["out_proj_bias"]
    lin_w, lin_b = params["linear_weight"], params["linear_bias"]

    B, A = attr.shape
    hidden = lin_w.shape[0]
    D, H, HD = D_MODEL, NUM_HEADS, HEAD_DIM
    V = A * num_bins
    Vp = ((V + 127) // 128) * 128                        # lane-dense one-hot width
    Hp = ((hidden + 127) // 128) * 128                   # lane-dense output width

    # ---- one-time parameter prep (fusion / layout plumbing, outside kernel) --
    #   qkv = (mask * onehot) @ (emb_table @ W_in.T) + b_in
    #   1/sqrt(HD) folded into the Q columns so the kernel never rescales.
    scale = 1.0 / math.sqrt(HD)
    w_qkv = jnp.dot(emb_table.astype(jnp.float32), in_w.astype(jnp.float32).T)
    w_qkv = w_qkv.at[:, :D].multiply(scale)
    w_qkv = jnp.pad(w_qkv, ((0, Vp - V), (0, 0))).astype(jnp.bfloat16)       # (Vp, 3D)
    b_qkv = in_b.astype(jnp.float32).at[:D].multiply(scale).reshape(1, 3 * D)
    w_out = out_w.T.astype(jnp.bfloat16)                                     # (D, D)
    b_out = out_b.reshape(1, D).astype(jnp.float32)
    w_lin = jnp.pad(lin_w.astype(jnp.float32).T,
                    ((0, 0), (0, Hp - hidden))).astype(jnp.bfloat16)         # (A*D, Hp)
    b_lin = jnp.pad(lin_b.astype(jnp.float32), (0, Hp - hidden)).reshape(1, Hp)

    # Block-ones score-reduction matrix: column h*A + j sums the head-h lanes of
    # the j-th q*k product block; padded to 128 columns (zero extra MXU cost).
    ws = np.zeros((A * D, 128), np.float32)
    for j in range(A):
        for h in range(H):
            ws[j * D + h * HD: j * D + (h + 1) * HD, h * A + j] = 1.0
    w_score = jnp.asarray(ws, dtype=jnp.bfloat16)

    # ---- index prep: fold the mask into the id (masked / padded rows -> -1) --
    offset = (jnp.arange(A, dtype=jnp.int32) * num_bins)[None, :]
    idx = attr.astype(jnp.int32) + offset                                    # (B, A)
    if mask is not None:
        idx = jnp.where(mask.astype(jnp.float32) > 0.0, idx, -1)

    TB = _pick_batch_tile(B)
    NT = (B + TB - 1) // TB
    Bp = NT * TB
    if Bp != B:
        idx = jnp.pad(idx, ((0, Bp - B), (0, 0)), constant_values=-1)
    # Tile-local, attribute-major stacking: block i holds [attr0 rows of batch
    # tile i; attr1 rows; ...] so the kernel's fused one-hot needs no reshape.
    idx_t = idx.reshape(NT, TB, A).transpose(0, 2, 1).reshape(NT * A * TB, 1)

    out_p = pl.pallas_call(
        _cond_embedder_kernel,
        out_shape=jax.ShapeDtypeStruct((Bp, Hp), jnp.float32),
        grid=(NT,),
        in_specs=[
            pl.BlockSpec((A * TB, 1), lambda i: (i, 0)),     # ids   (streamed)
            pl.BlockSpec(w_qkv.shape, lambda i: (0, 0)),     # weights / biases stay
            pl.BlockSpec(b_qkv.shape, lambda i: (0, 0)),     #   VMEM-resident
            pl.BlockSpec(w_out.shape, lambda i: (0, 0)),
            pl.BlockSpec(b_out.shape, lambda i: (0, 0)),
            pl.BlockSpec(w_score.shape, lambda i: (0, 0)),
            pl.BlockSpec(w_lin.shape, lambda i: (0, 0)),
            pl.BlockSpec(b_lin.shape, lambda i: (0, 0)),
        ],
        out_specs=pl.BlockSpec((TB, Hp), lambda i: (i, 0)),
        compiler_params=pltpu.CompilerParams(
            dimension_semantics=("parallel",),               # megacore / v7x 2 TCs
            vmem_limit_bytes=48 * 1024 * 1024,               # headroom on v7x's 64 MiB
        ),
    )(idx_t, w_qkv, b_qkv, w_out, b_out, w_score, w_lin, b_lin)

    return out_p[:B, :hidden]


def reference(attr, mask, params, num_bins):
    """Pure-JAX (f32) replica of the PyTorch forward for validation."""
    B, A = attr.shape
    idx = attr + (jnp.arange(A, dtype=attr.dtype) * num_bins)[None, :]
    x = params["embedding"][idx]                          # (B, A, 128)
    if mask is not None:
        x = x * mask[..., None].astype(x.dtype)
    qkv = x @ params["in_proj_weight"].T + params["in_proj_bias"]
    q, k, v = jnp.split(qkv, 3, axis=-1)

    def split_heads(t):
        return t.reshape(B, A, NUM_HEADS, HEAD_DIM).transpose(0, 2, 1, 3)

    qh, kh, vh = map(split_heads, (q, k, v))
    s = (qh @ kh.transpose(0, 1, 3, 2)) / math.sqrt(HEAD_DIM)
    p = jax.nn.softmax(s, axis=-1)
    o = (p @ vh).transpose(0, 2, 1, 3).reshape(B, A, D_MODEL)
    o = o @ params["out_proj_weight"].T + params["out_proj_bias"]
    flat = o.reshape(B, A * D_MODEL)
    return flat @ params["linear_weight"].T + params["linear_bias"]


if __name__ == "__main__":
    B, attr_dim, num_bins, hidden = 2, 4, 10, 32

    key = jax.random.PRNGKey(0)
    ks = jax.random.split(key, 8)
    params = {
        "embedding": jax.random.normal(ks[0], (attr_dim * num_bins, D_MODEL), jnp.float32) * 0.02,
        "in_proj_weight": jax.random.normal(ks[1], (3 * D_MODEL, D_MODEL), jnp.float32) * 0.05,
        "in_proj_bias": jax.random.normal(ks[2], (3 * D_MODEL,), jnp.float32) * 0.01,
        "out_proj_weight": jax.random.normal(ks[3], (D_MODEL, D_MODEL), jnp.float32) * 0.05,
        "out_proj_bias": jax.random.normal(ks[4], (D_MODEL,), jnp.float32) * 0.01,
        "linear_weight": jax.random.normal(ks[5], (hidden, attr_dim * D_MODEL), jnp.float32) * 0.05,
        "linear_bias": jax.random.normal(ks[6], (hidden,), jnp.float32) * 0.01,
    }

    attr = jax.random.randint(ks[7], (B, attr_dim), 0, num_bins, dtype=jnp.int32)
    mask = jnp.array([[1, 1, 0, 1],
                      [0, 1, 1, 1]], dtype=jnp.float32)

    out = discrete_cond_embedder(attr, mask, params, num_bins)
    out = jax.block_until_ready(out)

    ref = reference(attr, mask, params, num_bins)
    # bf16 MXU operands + approx reciprocal => slightly wider tolerance vs f32 ref.
    np.testing.assert_allclose(np.asarray(out), np.asarray(ref), rtol=3e-2, atol=2e-3)
    print("KERNEL_OK")
</pallas_src>

<mosaic_0001>
module attributes {stable_mosaic.version = 11 : i64} {
  func.func @_cond_embedder_kernel(%arg0: i32, %arg1: memref<64x1xi32, #tpu.memory_space<vmem>>, %arg2: memref<128x384xbf16, #tpu.memory_space<vmem>>, %arg3: memref<1x384xf32, #tpu.memory_space<vmem>>, %arg4: memref<128x128xbf16, #tpu.memory_space<vmem>>, %arg5: memref<1x128xf32, #tpu.memory_space<vmem>>, %arg6: memref<512x128xbf16, #tpu.memory_space<vmem>>, %arg7: memref<512x128xbf16, #tpu.memory_space<vmem>>, %arg8: memref<1x128xf32, #tpu.memory_space<vmem>>, %arg9: memref<16x128xf32, #tpu.memory_space<vmem>>) attributes {dimension_semantics = [#tpu.dimension_semantics<parallel>], iteration_bounds = array<i64: 1>, scalar_prefetch = 0 : i64, scratch_operands = 0 : i64, tpu.core_type = #tpu.core_type<tc>, window_params = [{transform_indices = @transform_0, window_bounds = array<i64: 64, 1>}, {pipeline_mode = #tpu.pipeline_mode<synchronous>, transform_indices = @transform_1, window_bounds = array<i64: 128, 384>}, {pipeline_mode = #tpu.pipeline_mode<synchronous>, transform_indices = @transform_2, window_bounds = array<i64: 1, 384>}, {pipeline_mode = #tpu.pipeline_mode<synchronous>, transform_indices = @transform_3, window_bounds = array<i64: 128, 128>}, {pipeline_mode = #tpu.pipeline_mode<synchronous>, transform_indices = @transform_4, window_bounds = array<i64: 1, 128>}, {pipeline_mode = #tpu.pipeline_mode<synchronous>, transform_indices = @transform_5, window_bounds = array<i64: 512, 128>}, {pipeline_mode = #tpu.pipeline_mode<synchronous>, transform_indices = @transform_6, window_bounds = array<i64: 512, 128>}, {pipeline_mode = #tpu.pipeline_mode<synchronous>, transform_indices = @transform_7, window_bounds = array<i64: 1, 128>}, {transform_indices = @transform_8, window_bounds = array<i64: 16, 128>}]} {
    %0 = tpu.iota {dimensions = array<i32: 1>} : vector<1x128xi32>
    %c0 = arith.constant 0 : index
    %c0_0 = arith.constant 0 : index
    %1 = vector.load %arg1[%c0, %c0_0] : memref<64x1xi32, #tpu.memory_space<vmem>>, vector<64x1xi32>
    %2 = vector.broadcast %1 : vector<64x1xi32> to vector<64x128xi32>
    %3 = vector.broadcast %0 : vector<1x128xi32> to vector<64x128xi32>
    %4 = arith.cmpi eq, %2, %3 : vector<64x128xi32>
    %5 = arith.extui %4 : vector<64x128xi1> to vector<64x128xi32>
    %6 = arith.sitofp %5 : vector<64x128xi32> to vector<64x128xf32>
    %7 = arith.truncf %6 : vector<64x128xf32> to vector<64x128xbf16>
    %c0_1 = arith.constant 0 : index
    %c0_2 = arith.constant 0 : index
    %8 = vector.load %arg2[%c0_1, %c0_2] : memref<128x384xbf16, #tpu.memory_space<vmem>>, vector<128x384xbf16>
    %cst = arith.constant dense<0.000000e+00> : vector<64x384xf32>
    %9 = tpu.matmul %7, %8, %cst {dimension_numbers = #tpu.dot_dimension_numbers<[1], [0], [0], [1], [0, 0, 1, 1], [], []>} : vector<64x128xbf16>, vector<128x384xbf16>, vector<64x384xf32> -> vector<64x384xf32>
    %c0_3 = arith.constant 0 : index
    %c0_4 = arith.constant 0 : index
    %10 = vector.load %arg3[%c0_3, %c0_4] : memref<1x384xf32, #tpu.memory_space<vmem>>, vector<1x384xf32>
    %11 = vector.broadcast %10 : vector<1x384xf32> to vector<64x384xf32>
    %12 = arith.addf %9, %11 : vector<64x384xf32>
    %13 = vector.extract_strided_slice %12 {offsets = [0, 0], sizes = [16, 128], strides = [1, 1]} : vector<64x384xf32> to vector<16x128xf32>
    %14 = vector.extract_strided_slice %12 {offsets = [16, 0], sizes = [16, 128], strides = [1, 1]} : vector<64x384xf32> to vector<16x128xf32>
    %15 = vector.extract_strided_slice %12 {offsets = [32, 0], sizes = [16, 128], strides = [1, 1]} : vector<64x384xf32> to vector<16x128xf32>
    %16 = vector.extract_strided_slice %12 {offsets = [48, 0], sizes = [16, 128], strides = [1, 1]} : vector<64x384xf32> to vector<16x128xf32>
    %17 = vector.extract_strided_slice %12 {offsets = [0, 128], sizes = [16, 128], strides = [1, 1]} : vector<64x384xf32> to vector<16x128xf32>
    %18 = vector.extract_strided_slice %12 {offsets = [16, 128], sizes = [16, 128], strides = [1, 1]} : vector<64x384xf32> to vector<16x128xf32>
    %19 = vector.extract_strided_slice %12 {offsets = [32, 128], sizes = [16, 128], strides = [1, 1]} : vector<64x384xf32> to vector<16x128xf32>
    %20 = vector.extract_strided_slice %12 {offsets = [48, 128], sizes = [16, 128], strides = [1, 1]} : vector<64x384xf32> to vector<16x128xf32>
    %21 = vector.extract_strided_slice %12 {offsets = [0, 256], sizes = [16, 128], strides = [1, 1]} : vector<64x384xf32> to vector<16x128xf32>
    %22 = vector.extract_strided_slice %12 {offsets = [16, 256], sizes = [16, 128], strides = [1, 1]} : vector<64x384xf32> to vector<16x128xf32>
    %23 = vector.extract_strided_slice %12 {offsets = [32, 256], sizes = [16, 128], strides = [1, 1]} : vector<64x384xf32> to vector<16x128xf32>
    %24 = vector.extract_strided_slice %12 {offsets = [48, 256], sizes = [16, 128], strides = [1, 1]} : vector<64x384xf32> to vector<16x128xf32>
    %c0_5 = arith.constant 0 : index
    %c0_6 = arith.constant 0 : index
    %25 = vector.load %arg6[%c0_5, %c0_6] : memref<512x128xbf16, #tpu.memory_space<vmem>>, vector<512x128xbf16>
    %26 = arith.mulf %13, %17 : vector<16x128xf32>
    %27 = arith.mulf %13, %18 : vector<16x128xf32>
    %28 = arith.mulf %13, %19 : vector<16x128xf32>
    %29 = arith.mulf %13, %20 : vector<16x128xf32>
    %30 = tpu.concatenate %26, %27, %28, %29 in 1 : vector<16x128xf32>, vector<16x128xf32>, vector<16x128xf32>, vector<16x128xf32> -> vector<16x512xf32>
    %31 = arith.truncf %30 : vector<16x512xf32> to vector<16x512xbf16>
    %cst_7 = arith.constant dense<0.000000e+00> : vector<16x128xf32>
    %32 = tpu.matmul %31, %25, %cst_7 {dimension_numbers = #tpu.dot_dimension_numbers<[1], [0], [0], [1], [0, 0, 1, 1], [], []>} : vector<16x512xbf16>, vector<512x128xbf16>, vector<16x128xf32> -> vector<16x128xf32>
    %33 = vector.extract_strided_slice %32 {offsets = [0, 0], sizes = [16, 4], strides = [1, 1]} : vector<16x128xf32> to vector<16x4xf32>
    %cst_8 = arith.constant dense<0xFF800000> : vector<16xf32>
    %34 = vector.multi_reduction <maximumf>, %33, %cst_8 [1] : vector<16x4xf32> to vector<16xf32>
    %35 = vector.shape_cast %34 : vector<16xf32> to vector<16x1xf32>
    %36 = vector.broadcast %35 : vector<16x1xf32> to vector<16x4xf32>
    %37 = arith.subf %33, %36 : vector<16x4xf32>
    %38 = math.exp %37 : vector<16x4xf32>
    %cst_9 = arith.constant dense<0.000000e+00> : vector<16xf32>
    %39 = vector.multi_reduction <add>, %38, %cst_9 [1] : vector<16x4xf32> to vector<16xf32>
    %40 = vector.shape_cast %39 : vector<16xf32> to vector<16x1xf32>
    %41 = tpu.reciprocal %40 {approx = true} : vector<16x1xf32> -> vector<16x1xf32>
    %42 = vector.extract_strided_slice %38 {offsets = [0, 0], sizes = [16, 1], strides = [1, 1]} : vector<16x4xf32> to vector<16x1xf32>
    %43 = vector.extract_strided_slice %21 {offsets = [0, 0], sizes = [16, 64], strides = [1, 1]} : vector<16x128xf32> to vector<16x64xf32>
    %44 = vector.broadcast %42 : vector<16x1xf32> to vector<16x64xf32>
    %45 = arith.mulf %44, %43 : vector<16x64xf32>
    %46 = vector.extract_strided_slice %38 {offsets = [0, 1], sizes = [16, 1], strides = [1, 1]} : vector<16x4xf32> to vector<16x1xf32>
    %47 = vector.extract_strided_slice %22 {offsets = [0, 0], sizes = [16, 64], strides = [1, 1]} : vector<16x128xf32> to vector<16x64xf32>
    %48 = vector.broadcast %46 : vector<16x1xf32> to vector<16x64xf32>
    %49 = arith.mulf %48, %47 : vector<16x64xf32>
    %50 = arith.addf %45, %49 : vector<16x64xf32>
    %51 = vector.extract_strided_slice %38 {offsets = [0, 2], sizes = [16, 1], strides = [1, 1]} : vector<16x4xf32> to vector<16x1xf32>
    %52 = vector.extract_strided_slice %23 {offsets = [0, 0], sizes = [16, 64], strides = [1, 1]} : vector<16x128xf32> to vector<16x64xf32>
    %53 = vector.broadcast %51 : vector<16x1xf32> to vector<16x64xf32>
    %54 = arith.mulf %53, %52 : vector<16x64xf32>
    %55 = arith.addf %50, %54 : vector<16x64xf32>
    %56 = vector.extract_strided_slice %38 {offsets = [0, 3], sizes = [16, 1], strides = [1, 1]} : vector<16x4xf32> to vector<16x1xf32>
    %57 = vector.extract_strided_slice %24 {offsets = [0, 0], sizes = [16, 64], strides = [1, 1]} : vector<16x128xf32> to vector<16x64xf32>
    %58 = vector.broadcast %56 : vector<16x1xf32> to vector<16x64xf32>
    %59 = arith.mulf %58, %57 : vector<16x64xf32>
    %60 = arith.addf %55, %59 : vector<16x64xf32>
    %61 = vector.broadcast %41 : vector<16x1xf32> to vector<16x64xf32>
    %62 = arith.mulf %60, %61 : vector<16x64xf32>
    %63 = vector.extract_strided_slice %32 {offsets = [0, 4], sizes = [16, 4], strides = [1, 1]} : vector<16x128xf32> to vector<16x4xf32>
    %cst_10 = arith.constant dense<0xFF800000> : vector<16xf32>
    %64 = vector.multi_reduction <maximumf>, %63, %cst_10 [1] : vector<16x4xf32> to vector<16xf32>
    %65 = vector.shape_cast %64 : vector<16xf32> to vector<16x1xf32>
    %66 = vector.broadcast %65 : vector<16x1xf32> to vector<16x4xf32>
    %67 = arith.subf %63, %66 : vector<16x4xf32>
    %68 = math.exp %67 : vector<16x4xf32>
    %cst_11 = arith.constant dense<0.000000e+00> : vector<16xf32>
    %69 = vector.multi_reduction <add>, %68, %cst_11 [1] : vector<16x4xf32> to vector<16xf32>
    %70 = vector.shape_cast %69 : vector<16xf32> to vector<16x1xf32>
    %71 = tpu.reciprocal %70 {approx = true} : vector<16x1xf32> -> vector<16x1xf32>
    %72 = vector.extract_strided_slice %68 {offsets = [0, 0], sizes = [16, 1], strides = [1, 1]} : vector<16x4xf32> to vector<16x1xf32>
    %73 = vector.extract_strided_slice %21 {offsets = [0, 64], sizes = [16, 64], strides = [1, 1]} : vector<16x128xf32> to vector<16x64xf32>
    %74 = vector.broadcast %72 : vector<16x1xf32> to vector<16x64xf32>
    %75 = arith.mulf %74, %73 : vector<16x64xf32>
    %76 = vector.extract_strided_slice %68 {offsets = [0, 1], sizes = [16, 1], strides = [1, 1]} : vector<16x4xf32> to vector<16x1xf32>
    %77 = vector.extract_strided_slice %22 {offsets = [0, 64], sizes = [16, 64], strides = [1, 1]} : vector<16x128xf32> to vector<16x64xf32>
    %78 = vector.broadcast %76 : vector<16x1xf32> to vector<16x64xf32>
    %79 = arith.mulf %78, %77 : vector<16x64xf32>
    %80 = arith.addf %75, %79 : vector<16x64xf32>
    %81 = vector.extract_strided_slice %68 {offsets = [0, 2], sizes = [16, 1], strides = [1, 1]} : vector<16x4xf32> to vector<16x1xf32>
    %82 = vector.extract_strided_slice %23 {offsets = [0, 64], sizes = [16, 64], strides = [1, 1]} : vector<16x128xf32> to vector<16x64xf32>
    %83 = vector.broadcast %81 : vector<16x1xf32> to vector<16x64xf32>
    %84 = arith.mulf %83, %82 : vector<16x64xf32>
    %85 = arith.addf %80, %84 : vector<16x64xf32>
    %86 = vector.extract_strided_slice %68 {offsets = [0, 3], sizes = [16, 1], strides = [1, 1]} : vector<16x4xf32> to vector<16x1xf32>
    %87 = vector.extract_strided_slice %24 {offsets = [0, 64], sizes = [16, 64], strides = [1, 1]} : vector<16x128xf32> to vector<16x64xf32>
    %88 = vector.broadcast %86 : vector<16x1xf32> to vector<16x64xf32>
    %89 = arith.mulf %88, %87 : vector<16x64xf32>
    %90 = arith.addf %85, %89 : vector<16x64xf32>
    %91 = vector.broadcast %71 : vector<16x1xf32> to vector<16x64xf32>
    %92 = arith.mulf %90, %91 : vector<16x64xf32>
    %93 = arith.mulf %14, %17 : vector<16x128xf32>
    %94 = arith.mulf %14, %18 : vector<16x128xf32>
    %95 = arith.mulf %14, %19 : vector<16x128xf32>
    %96 = arith.mulf %14, %20 : vector<16x128xf32>
    %97 = tpu.concatenate %93, %94, %95, %96 in 1 : vector<16x128xf32>, vector<16x128xf32>, vector<16x128xf32>, vector<16x128xf32> -> vector<16x512xf32>
    %98 = arith.truncf %97 : vector<16x512xf32> to vector<16x512xbf16>
    %cst_12 = arith.constant dense<0.000000e+00> : vector<16x128xf32>
    %99 = tpu.matmul %98, %25, %cst_12 {dimension_numbers = #tpu.dot_dimension_numbers<[1], [0], [0], [1], [0, 0, 1, 1], [], []>} : vector<16x512xbf16>, vector<512x128xbf16>, vector<16x128xf32> -> vector<16x128xf32>
    %100 = vector.extract_strided_slice %99 {offsets = [0, 0], sizes = [16, 4], strides = [1, 1]} : vector<16x128xf32> to vector<16x4xf32>
    %cst_13 = arith.constant dense<0xFF800000> : vector<16xf32>
    %101 = vector.multi_reduction <maximumf>, %100, %cst_13 [1] : vector<16x4xf32> to vector<16xf32>
    %102 = vector.shape_cast %101 : vector<16xf32> to vector<16x1xf32>
    %103 = vector.broadcast %102 : vector<16x1xf32> to vector<16x4xf32>
    %104 = arith.subf %100, %103 : vector<16x4xf32>
    %105 = math.exp %104 : vector<16x4xf32>
    %cst_14 = arith.constant dense<0.000000e+00> : vector<16xf32>
    %106 = vector.multi_reduction <add>, %105, %cst_14 [1] : vector<16x4xf32> to vector<16xf32>
    %107 = vector.shape_cast %106 : vector<16xf32> to vector<16x1xf32>
    %108 = tpu.reciprocal %107 {approx = true} : vector<16x1xf32> -> vector<16x1xf32>
    %109 = vector.extract_strided_slice %105 {offsets = [0, 0], sizes = [16, 1], strides = [1, 1]} : vector<16x4xf32> to vector<16x1xf32>
    %110 = vector.extract_strided_slice %21 {offsets = [0, 0], sizes = [16, 64], strides = [1, 1]} : vector<16x128xf32> to vector<16x64xf32>
    %111 = vector.broadcast %109 : vector<16x1xf32> to vector<16x64xf32>
    %112 = arith.mulf %111, %110 : vector<16x64xf32>
    %113 = vector.extract_strided_slice %105 {offsets = [0, 1], sizes = [16, 1], strides = [1, 1]} : vector<16x4xf32> to vector<16x1xf32>
    %114 = vector.extract_strided_slice %22 {offsets = [0, 0], sizes = [16, 64], strides = [1, 1]} : vector<16x128xf32> to vector<16x64xf32>
    %115 = vector.broadcast %113 : vector<16x1xf32> to vector<16x64xf32>
    %116 = arith.mulf %115, %114 : vector<16x64xf32>
    %117 = arith.addf %112, %116 : vector<16x64xf32>
    %118 = vector.extract_strided_slice %105 {offsets = [0, 2], sizes = [16, 1], strides = [1, 1]} : vector<16x4xf32> to vector<16x1xf32>
    %119 = vector.extract_strided_slice %23 {offsets = [0, 0], sizes = [16, 64], strides = [1, 1]} : vector<16x128xf32> to vector<16x64xf32>
    %120 = vector.broadcast %118 : vector<16x1xf32> to vector<16x64xf32>
    %121 = arith.mulf %120, %119 : vector<16x64xf32>
    %122 = arith.addf %117, %121 : vector<16x64xf32>
    %123 = vector.extract_strided_slice %105 {offsets = [0, 3], sizes = [16, 1], strides = [1, 1]} : vector<16x4xf32> to vector<16x1xf32>
    %124 = vector.extract_strided_slice %24 {offsets = [0, 0], sizes = [16, 64], strides = [1, 1]} : vector<16x128xf32> to vector<16x64xf32>
    %125 = vector.broadcast %123 : vector<16x1xf32> to vector<16x64xf32>
    %126 = arith.mulf %125, %124 : vector<16x64xf32>
    %127 = arith.addf %122, %126 : vector<16x64xf32>
    %128 = vector.broadcast %108 : vector<16x1xf32> to vector<16x64xf32>
    %129 = arith.mulf %127, %128 : vector<16x64xf32>
    %130 = vector.extract_strided_slice %99 {offsets = [0, 4], sizes = [16, 4], strides = [1, 1]} : vector<16x128xf32> to vector<16x4xf32>
    %cst_15 = arith.constant dense<0xFF800000> : vector<16xf32>
    %131 = vector.multi_reduction <maximumf>, %130, %cst_15 [1] : vector<16x4xf32> to vector<16xf32>
    %132 = vector.shape_cast %131 : vector<16xf32> to vector<16x1xf32>
    %133 = vector.broadcast %132 : vector<16x1xf32> to vector<16x4xf32>
    %134 = arith.subf %130, %133 : vector<16x4xf32>
    %135 = math.exp %134 : vector<16x4xf32>
    %cst_16 = arith.constant dense<0.000000e+00> : vector<16xf32>
    %136 = vector.multi_reduction <add>, %135, %cst_16 [1] : vector<16x4xf32> to vector<16xf32>
    %137 = vector.shape_cast %136 : vector<16xf32> to vector<16x1xf32>
    %138 = tpu.reciprocal %137 {approx = true} : vector<16x1xf32> -> vector<16x1xf32>
    %139 = vector.extract_strided_slice %135 {offsets = [0, 0], sizes = [16, 1], strides = [1, 1]} : vector<16x4xf32> to vector<16x1xf32>
    %140 = vector.extract_strided_slice %21 {offsets = [0, 64], sizes = [16, 64], strides = [1, 1]} : vector<16x128xf32> to vector<16x64xf32>
    %141 = vector.broadcast %139 : vector<16x1xf32> to vector<16x64xf32>
    %142 = arith.mulf %141, %140 : vector<16x64xf32>
    %143 = vector.extract_strided_slice %135 {offsets = [0, 1], sizes = [16, 1], strides = [1, 1]} : vector<16x4xf32> to vector<16x1xf32>
    %144 = vector.extract_strided_slice %22 {offsets = [0, 64], sizes = [16, 64], strides = [1, 1]} : vector<16x128xf32> to vector<16x64xf32>
    %145 = vector.broadcast %143 : vector<16x1xf32> to vector<16x64xf32>
    %146 = arith.mulf %145, %144 : vector<16x64xf32>
    %147 = arith.addf %142, %146 : vector<16x64xf32>
    %148 = vector.extract_strided_slice %135 {offsets = [0, 2], sizes = [16, 1], strides = [1, 1]} : vector<16x4xf32> to vector<16x1xf32>
    %149 = vector.extract_strided_slice %23 {offsets = [0, 64], sizes = [16, 64], strides = [1, 1]} : vector<16x128xf32> to vector<16x64xf32>
    %150 = vector.broadcast %148 : vector<16x1xf32> to vector<16x64xf32>
    %151 = arith.mulf %150, %149 : vector<16x64xf32>
    %152 = arith.addf %147, %151 : vector<16x64xf32>
    %153 = vector.extract_strided_slice %135 {offsets = [0, 3], sizes = [16, 1], strides = [1, 1]} : vector<16x4xf32> to vector<16x1xf32>
    %154 = vector.extract_strided_slice %24 {offsets = [0, 64], sizes = [16, 64], strides = [1, 1]} : vector<16x128xf32> to vector<16x64xf32>
    %155 = vector.broadcast %153 : vector<16x1xf32> to vector<16x64xf32>
    %156 = arith.mulf %155, %154 : vector<16x64xf32>
    %157 = arith.addf %152, %156 : vector<16x64xf32>
    %158 = vector.broadcast %138 : vector<16x1xf32> to vector<16x64xf32>
    %159 = arith.mulf %157, %158 : vector<16x64xf32>
    %160 = arith.mulf %15, %17 : vector<16x128xf32>
    %161 = arith.mulf %15, %18 : vector<16x128xf32>
    %162 = arith.mulf %15, %19 : vector<16x128xf32>
    %163 = arith.mulf %15, %20 : vector<16x128xf32>
    %164 = tpu.concatenate %160, %161, %162, %163 in 1 : vector<16x128xf32>, vector<16x128xf32>, vector<16x128xf32>, vector<16x128xf32> -> vector<16x512xf32>
    %165 = arith.truncf %164 : vector<16x512xf32> to vector<16x512xbf16>
    %cst_17 = arith.constant dense<0.000000e+00> : vector<16x128xf32>
    %166 = tpu.matmul %165, %25, %cst_17 {dimension_numbers = #tpu.dot_dimension_numbers<[1], [0], [0], [1], [0, 0, 1, 1], [], []>} : vector<16x512xbf16>, vector<512x128xbf16>, vector<16x128xf32> -> vector<16x128xf32>
    %167 = vector.extract_strided_slice %166 {offsets = [0, 0], sizes = [16, 4], strides = [1, 1]} : vector<16x128xf32> to vector<16x4xf32>
    %cst_18 = arith.constant dense<0xFF800000> : vector<16xf32>
    %168 = vector.multi_reduction <maximumf>, %167, %cst_18 [1] : vector<16x4xf32> to vector<16xf32>
    %169 = vector.shape_cast %168 : vector<16xf32> to vector<16x1xf32>
    %170 = vector.broadcast %169 : vector<16x1xf32> to vector<16x4xf32>
    %171 = arith.subf %167, %170 : vector<16x4xf32>
    %172 = math.exp %171 : vector<16x4xf32>
    %cst_19 = arith.constant dense<0.000000e+00> : vector<16xf32>
    %173 = vector.multi_reduction <add>, %172, %cst_19 [1] : vector<16x4xf32> to vector<16xf32>
    %174 = vector.shape_cast %173 : vector<16xf32> to vector<16x1xf32>
    %175 = tpu.reciprocal %174 {approx = true} : vector<16x1xf32> -> vector<16x1xf32>
    %176 = vector.extract_strided_slice %172 {offsets = [0, 0], sizes = [16, 1], strides = [1, 1]} : vector<16x4xf32> to vector<16x1xf32>
    %177 = vector.extract_strided_slice %21 {offsets = [0, 0], sizes = [16, 64], strides = [1, 1]} : vector<16x128xf32> to vector<16x64xf32>
    %178 = vector.broadcast %176 : vector<16x1xf32> to vector<16x64xf32>
    %179 = arith.mulf %178, %177 : vector<16x64xf32>
    %180 = vector.extract_strided_slice %172 {offsets = [0, 1], sizes = [16, 1], strides = [1, 1]} : vector<16x4xf32> to vector<16x1xf32>
    %181 = vector.extract_strided_slice %22 {offsets = [0, 0], sizes = [16, 64], strides = [1, 1]} : vector<16x128xf32> to vector<16x64xf32>
    %182 = vector.broadcast %180 : vector<16x1xf32> to vector<16x64xf32>
    %183 = arith.mulf %182, %181 : vector<16x64xf32>
    %184 = arith.addf %179, %183 : vector<16x64xf32>
    %185 = vector.extract_strided_slice %172 {offsets = [0, 2], sizes = [16, 1], strides = [1, 1]} : vector<16x4xf32> to vector<16x1xf32>
    %186 = vector.extract_strided_slice %23 {offsets = [0, 0], sizes = [16, 64], strides = [1, 1]} : vector<16x128xf32> to vector<16x64xf32>
    %187 = vector.broadcast %185 : vector<16x1xf32> to vector<16x64xf32>
    %188 = arith.mulf %187, %186 : vector<16x64xf32>
    %189 = arith.addf %184, %188 : vector<16x64xf32>
    %190 = vector.extract_strided_slice %172 {offsets = [0, 3], sizes = [16, 1], strides = [1, 1]} : vector<16x4xf32> to vector<16x1xf32>
    %191 = vector.extract_strided_slice %24 {offsets = [0, 0], sizes = [16, 64], strides = [1, 1]} : vector<16x128xf32> to vector<16x64xf32>
    %192 = vector.broadcast %190 : vector<16x1xf32> to vector<16x64xf32>
    %193 = arith.mulf %192, %191 : vector<16x64xf32>
    %194 = arith.addf %189, %193 : vector<16x64xf32>
    %195 = vector.broadcast %175 : vector<16x1xf32> to vector<16x64xf32>
    %196 = arith.mulf %194, %195 : vector<16x64xf32>
    %197 = vector.extract_strided_slice %166 {offsets = [0, 4], sizes = [16, 4], strides = [1, 1]} : vector<16x128xf32> to vector<16x4xf32>
    %cst_20 = arith.constant dense<0xFF800000> : vector<16xf32>
    %198 = vector.multi_reduction <maximumf>, %197, %cst_20 [1] : vector<16x4xf32> to vector<16xf32>
    %199 = vector.shape_cast %198 : vector<16xf32> to vector<16x1xf32>
    %200 = vector.broadcast %199 : vector<16x1xf32> to vector<16x4xf32>
    %201 = arith.subf %197, %200 : vector<16x4xf32>
    %202 = math.exp %201 : vector<16x4xf32>
    %cst_21 = arith.constant dense<0.000000e+00> : vector<16xf32>
    %203 = vector.multi_reduction <add>, %202, %cst_21 [1] : vector<16x4xf32> to vector<16xf32>
    %204 = vector.shape_cast %203 : vector<16xf32> to vector<16x1xf32>
    %205 = tpu.reciprocal %204 {approx = true} : vector<16x1xf32> -> vector<16x1xf32>
    %206 = vector.extract_strided_slice %202 {offsets = [0, 0], sizes = [16, 1], strides = [1, 1]} : vector<16x4xf32> to vector<16x1xf32>
    %207 = vector.extract_strided_slice %21 {offsets = [0, 64], sizes = [16, 64], strides = [1, 1]} : vector<16x128xf32> to vector<16x64xf32>
    %208 = vector.broadcast %206 : vector<16x1xf32> to vector<16x64xf32>
    %209 = arith.mulf %208, %207 : vector<16x64xf32>
    %210 = vector.extract_strided_slice %202 {offsets = [0, 1], sizes = [16, 1], strides = [1, 1]} : vector<16x4xf32> to vector<16x1xf32>
    %211 = vector.extract_strided_slice %22 {offsets = [0, 64], sizes = [16, 64], strides = [1, 1]} : vector<16x128xf32> to vector<16x64xf32>
    %212 = vector.broadcast %210 : vector<16x1xf32> to vector<16x64xf32>
    %213 = arith.mulf %212, %211 : vector<16x64xf32>
    %214 = arith.addf %209, %213 : vector<16x64xf32>
    %215 = vector.extract_strided_slice %202 {offsets = [0, 2], sizes = [16, 1], strides = [1, 1]} : vector<16x4xf32> to vector<16x1xf32>
    %216 = vector.extract_strided_slice %23 {offsets = [0, 64], sizes = [16, 64], strides = [1, 1]} : vector<16x128xf32> to vector<16x64xf32>
    %217 = vector.broadcast %215 : vector<16x1xf32> to vector<16x64xf32>
    %218 = arith.mulf %217, %216 : vector<16x64xf32>
    %219 = arith.addf %214, %218 : vector<16x64xf32>
    %220 = vector.extract_strided_slice %202 {offsets = [0, 3], sizes = [16, 1], strides = [1, 1]} : vector<16x4xf32> to vector<16x1xf32>
    %221 = vector.extract_strided_slice %24 {offsets = [0, 64], sizes = [16, 64], strides = [1, 1]} : vector<16x128xf32> to vector<16x64xf32>
    %222 = vector.broadcast %220 : vector<16x1xf32> to vector<16x64xf32>
    %223 = arith.mulf %222, %221 : vector<16x64xf32>
    %224 = arith.addf %219, %223 : vector<16x64xf32>
    %225 = vector.broadcast %205 : vector<16x1xf32> to vector<16x64xf32>
    %226 = arith.mulf %224, %225 : vector<16x64xf32>
    %227 = arith.mulf %16, %17 : vector<16x128xf32>
    %228 = arith.mulf %16, %18 : vector<16x128xf32>
    %229 = arith.mulf %16, %19 : vector<16x128xf32>
    %230 = arith.mulf %16, %20 : vector<16x128xf32>
    %231 = tpu.concatenate %227, %228, %229, %230 in 1 : vector<16x128xf32>, vector<16x128xf32>, vector<16x128xf32>, vector<16x128xf32> -> vector<16x512xf32>
    %232 = arith.truncf %231 : vector<16x512xf32> to vector<16x512xbf16>
    %cst_22 = arith.constant dense<0.000000e+00> : vector<16x128xf32>
    %233 = tpu.matmul %232, %25, %cst_22 {dimension_numbers = #tpu.dot_dimension_numbers<[1], [0], [0], [1], [0, 0, 1, 1], [], []>} : vector<16x512xbf16>, vector<512x128xbf16>, vector<16x128xf32> -> vector<16x128xf32>
    %234 = vector.extract_strided_slice %233 {offsets = [0, 0], sizes = [16, 4], strides = [1, 1]} : vector<16x128xf32> to vector<16x4xf32>
    %cst_23 = arith.constant dense<0xFF800000> : vector<16xf32>
    %235 = vector.multi_reduction <maximumf>, %234, %cst_23 [1] : vector<16x4xf32> to vector<16xf32>
    %236 = vector.shape_cast %235 : vector<16xf32> to vector<16x1xf32>
    %237 = vector.broadcast %236 : vector<16x1xf32> to vector<16x4xf32>
    %238 = arith.subf %234, %237 : vector<16x4xf32>
    %239 = math.exp %238 : vector<16x4xf32>
    %cst_24 = arith.constant dense<0.000000e+00> : vector<16xf32>
    %240 = vector.multi_reduction <add>, %239, %cst_24 [1] : vector<16x4xf32> to vector<16xf32>
    %241 = vector.shape_cast %240 : vector<16xf32> to vector<16x1xf32>
    %242 = tpu.reciprocal %241 {approx = true} : vector<16x1xf32> -> vector<16x1xf32>
    %243 = vector.extract_strided_slice %239 {offsets = [0, 0], sizes = [16, 1], strides = [1, 1]} : vector<16x4xf32> to vector<16x1xf32>
    %244 = vector.extract_strided_slice %21 {offsets = [0, 0], sizes = [16, 64], strides = [1, 1]} : vector<16x128xf32> to vector<16x64xf32>
    %245 = vector.broadcast %243 : vector<16x1xf32> to vector<16x64xf32>
    %246 = arith.mulf %245, %244 : vector<16x64xf32>
    %247 = vector.extract_strided_slice %239 {offsets = [0, 1], sizes = [16, 1], strides = [1, 1]} : vector<16x4xf32> to vector<16x1xf32>
    %248 = vector.extract_strided_slice %22 {offsets = [0, 0], sizes = [16, 64], strides = [1, 1]} : vector<16x128xf32> to vector<16x64xf32>
    %249 = vector.broadcast %247 : vector<16x1xf32> to vector<16x64xf32>
    %250 = arith.mulf %249, %248 : vector<16x64xf32>
    %251 = arith.addf %246, %250 : vector<16x64xf32>
    %252 = vector.extract_strided_slice %239 {offsets = [0, 2], sizes = [16, 1], strides = [1, 1]} : vector<16x4xf32> to vector<16x1xf32>
    %253 = vector.extract_strided_slice %23 {offsets = [0, 0], sizes = [16, 64], strides = [1, 1]} : vector<16x128xf32> to vector<16x64xf32>
    %254 = vector.broadcast %252 : vector<16x1xf32> to vector<16x64xf32>
    %255 = arith.mulf %254, %253 : vector<16x64xf32>
    %256 = arith.addf %251, %255 : vector<16x64xf32>
    %257 = vector.extract_strided_slice %239 {offsets = [0, 3], sizes = [16, 1], strides = [1, 1]} : vector<16x4xf32> to vector<16x1xf32>
    %258 = vector.extract_strided_slice %24 {offsets = [0, 0], sizes = [16, 64], strides = [1, 1]} : vector<16x128xf32> to vector<16x64xf32>
    %259 = vector.broadcast %257 : vector<16x1xf32> to vector<16x64xf32>
    %260 = arith.mulf %259, %258 : vector<16x64xf32>
    %261 = arith.addf %256, %260 : vector<16x64xf32>
    %262 = vector.broadcast %242 : vector<16x1xf32> to vector<16x64xf32>
    %263 = arith.mulf %261, %262 : vector<16x64xf32>
    %264 = vector.extract_strided_slice %233 {offsets = [0, 4], sizes = [16, 4], strides = [1, 1]} : vector<16x128xf32> to vector<16x4xf32>
    %cst_25 = arith.constant dense<0xFF800000> : vector<16xf32>
    %265 = vector.multi_reduction <maximumf>, %264, %cst_25 [1] : vector<16x4xf32> to vector<16xf32>
    %266 = vector.shape_cast %265 : vector<16xf32> to vector<16x1xf32>
    %267 = vector.broadcast %266 : vector<16x1xf32> to vector<16x4xf32>
    %268 = arith.subf %264, %267 : vector<16x4xf32>
    %269 = math.exp %268 : vector<16x4xf32>
    %cst_26 = arith.constant dense<0.000000e+00> : vector<16xf32>
    %270 = vector.multi_reduction <add>, %269, %cst_26 [1] : vector<16x4xf32> to vector<16xf32>
    %271 = vector.shape_cast %270 : vector<16xf32> to vector<16x1xf32>
    %272 = tpu.reciprocal %271 {approx = true} : vector<16x1xf32> -> vector<16x1xf32>
    %273 = vector.extract_strided_slice %269 {offsets = [0, 0], sizes = [16, 1], strides = [1, 1]} : vector<16x4xf32> to vector<16x1xf32>
    %274 = vector.extract_strided_slice %21 {offsets = [0, 64], sizes = [16, 64], strides = [1, 1]} : vector<16x128xf32> to vector<16x64xf32>
    %275 = vector.broadcast %273 : vector<16x1xf32> to vector<16x64xf32>
    %276 = arith.mulf %275, %274 : vector<16x64xf32>
    %277 = vector.extract_strided_slice %269 {offsets = [0, 1], sizes = [16, 1], strides = [1, 1]} : vector<16x4xf32> to vector<16x1xf32>
    %278 = vector.extract_strided_slice %22 {offsets = [0, 64], sizes = [16, 64], strides = [1, 1]} : vector<16x128xf32> to vector<16x64xf32>
    %279 = vector.broadcast %277 : vector<16x1xf32> to vector<16x64xf32>
    %280 = arith.mulf %279, %278 : vector<16x64xf32>
    %281 = arith.addf %276, %280 : vector<16x64xf32>
    %282 = vector.extract_strided_slice %269 {offsets = [0, 2], sizes = [16, 1], strides = [1, 1]} : vector<16x4xf32> to vector<16x1xf32>
    %283 = vector.extract_strided_slice %23 {offsets = [0, 64], sizes = [16, 64], strides = [1, 1]} : vector<16x128xf32> to vector<16x64xf32>
    %284 = vector.broadcast %282 : vector<16x1xf32> to vector<16x64xf32>
    %285 = arith.mulf %284, %283 : vector<16x64xf32>
    %286 = arith.addf %281, %285 : vector<16x64xf32>
    %287 = vector.extract_strided_slice %269 {offsets = [0, 3], sizes = [16, 1], strides = [1, 1]} : vector<16x4xf32> to vector<16x1xf32>
    %288 = vector.extract_strided_slice %24 {offsets = [0, 64], sizes = [16, 64], strides = [1, 1]} : vector<16x128xf32> to vector<16x64xf32>
    %289 = vector.broadcast %287 : vector<16x1xf32> to vector<16x64xf32>
    %290 = arith.mulf %289, %288 : vector<16x64xf32>
    %291 = arith.addf %286, %290 : vector<16x64xf32>
    %292 = vector.broadcast %272 : vector<16x1xf32> to vector<16x64xf32>
    %293 = arith.mulf %291, %292 : vector<16x64xf32>
    %c0_27 = arith.constant 0 : index
    %c0_28 = arith.constant 0 : index
    %294 = vector.load %arg4[%c0_27, %c0_28] : memref<128x128xbf16, #tpu.memory_space<vmem>>, vector<128x128xbf16>
    %295 = tpu.concatenate %62, %129, %196, %263 in 0 : vector<16x64xf32>, vector<16x64xf32>, vector<16x64xf32>, vector<16x64xf32> -> vector<64x64xf32>
    %296 = arith.truncf %295 : vector<64x64xf32> to vector<64x64xbf16>
    %297 = vector.extract_strided_slice %294 {offsets = [0, 0], sizes = [64, 128], strides = [1, 1]} : vector<128x128xbf16> to vector<64x128xbf16>
    %cst_29 = arith.constant dense<0.000000e+00> : vector<64x128xf32>
    %298 = tpu.matmul %296, %297, %cst_29 {dimension_numbers = #tpu.dot_dimension_numbers<[1], [0], [0], [1], [0, 0, 1, 1], [], []>} : vector<64x64xbf16>, vector<64x128xbf16>, vector<64x128xf32> -> vector<64x128xf32>
    %299 = tpu.concatenate %92, %159, %226, %293 in 0 : vector<16x64xf32>, vector<16x64xf32>, vector<16x64xf32>, vector<16x64xf32> -> vector<64x64xf32>
    %300 = arith.truncf %299 : vector<64x64xf32> to vector<64x64xbf16>
    %301 = vector.extract_strided_slice %294 {offsets = [64, 0], sizes = [64, 128], strides = [1, 1]} : vector<128x128xbf16> to vector<64x128xbf16>
    %cst_30 = arith.constant dense<0.000000e+00> : vector<64x128xf32>
    %302 = tpu.matmul %300, %301, %cst_30 {dimension_numbers = #tpu.dot_dimension_numbers<[1], [0], [0], [1], [0, 0, 1, 1], [], []>} : vector<64x64xbf16>, vector<64x128xbf16>, vector<64x128xf32> -> vector<64x128xf32>
    %303 = arith.addf %298, %302 : vector<64x128xf32>
    %c0_31 = arith.constant 0 : index
    %c0_32 = arith.constant 0 : index
    %304 = vector.load %arg5[%c0_31, %c0_32] : memref<1x128xf32, #tpu.memory_space<vmem>>, vector<1x128xf32>
    %305 = vector.broadcast %304 : vector<1x128xf32> to vector<64x128xf32>
    %306 = arith.addf %303, %305 : vector<64x128xf32>
    %307 = vector.extract_strided_slice %306 {offsets = [0, 0], sizes = [16, 128], strides = [1, 1]} : vector<64x128xf32> to vector<16x128xf32>
    %308 = vector.extract_strided_slice %306 {offsets = [16, 0], sizes = [16, 128], strides = [1, 1]} : vector<64x128xf32> to vector<16x128xf32>
    %309 = vector.extract_strided_slice %306 {offsets = [32, 0], sizes = [16, 128], strides = [1, 1]} : vector<64x128xf32> to vector<16x128xf32>
    %310 = vector.extract_strided_slice %306 {offsets = [48, 0], sizes = [16, 128], strides = [1, 1]} : vector<64x128xf32> to vector<16x128xf32>
    %311 = tpu.concatenate %307, %308, %309, %310 in 1 : vector<16x128xf32>, vector<16x128xf32>, vector<16x128xf32>, vector<16x128xf32> -> vector<16x512xf32>
    %312 = arith.truncf %311 : vector<16x512xf32> to vector<16x512xbf16>
    %c0_33 = arith.constant 0 : index
    %c0_34 = arith.constant 0 : index
    %313 = vector.load %arg7[%c0_33, %c0_34] : memref<512x128xbf16, #tpu.memory_space<vmem>>, vector<512x128xbf16>
    %cst_35 = arith.constant dense<0.000000e+00> : vector<16x128xf32>
    %314 = tpu.matmul %312, %313, %cst_35 {dimension_numbers = #tpu.dot_dimension_numbers<[1], [0], [0], [1], [0, 0, 1, 1], [], []>} : vector<16x512xbf16>, vector<512x128xbf16>, vector<16x128xf32> -> vector<16x128xf32>
    %c0_36 = arith.constant 0 : index
    %c0_37 = arith.constant 0 : index
    %315 = vector.load %arg8[%c0_36, %c0_37] : memref<1x128xf32, #tpu.memory_space<vmem>>, vector<1x128xf32>
    %316 = vector.broadcast %315 : vector<1x128xf32> to vector<16x128xf32>
    %317 = arith.addf %314, %316 : vector<16x128xf32>
    %c0_38 = arith.constant 0 : index
    %c0_39 = arith.constant 0 : index
    %318 = vector.load %arg9[%c0_38, %c0_39] : memref<16x128xf32, #tpu.memory_space<vmem>>, vector<16x128xf32>
    tpu.vector_store %arg9[%c0_38, %c0_39], %317 {strides = array<i32>} : memref<16x128xf32, #tpu.memory_space<vmem>>, vector<16x128xf32>,
    return
  }
  func.func @transform_0(%arg0: i32) -> (i32, i32) {
    %c0_i32 = arith.constant 0 : i32
    %c0_i32_0 = arith.constant 0 : i32
    return %arg0, %c0_i32 : i32, i32
  }
  func.func @transform_1(%arg0: i32) -> (i32, i32) {
    %c0_i32 = arith.constant 0 : i32
    %c0_i32_0 = arith.constant 0 : i32
    %c0_i32_1 = arith.constant 0 : i32
    return %c0_i32, %c0_i32_0 : i32, i32
  }
  func.func @transform_2(%arg0: i32) -> (i32, i32) {
    %c0_i32 = arith.constant 0 : i32
    %c0_i32_0 = arith.constant 0 : i32
    %c0_i32_1 = arith.constant 0 : i32
    return %c0_i32, %c0_i32_0 : i32, i32
  }
  func.func @transform_3(%arg0: i32) -> (i32, i32) {
    %c0_i32 = arith.constant 0 : i32
    %c0_i32_0 = arith.constant 0 : i32
    %c0_i32_1 = arith.constant 0 : i32
    return %c0_i32, %c0_i32_0 : i32, i32
  }
  func.func @transform_4(%arg0: i32) -> (i32, i32) {
    %c0_i32 = arith.constant 0 : i32
    %c0_i32_0 = arith.constant 0 : i32
    %c0_i32_1 = arith.constant 0 : i32
    return %c0_i32, %c0_i32_0 : i32, i32
  }
  func.func @transform_5(%arg0: i32) -> (i32, i32) {
    %c0_i32 = arith.constant 0 : i32
    %c0_i32_0 = arith.constant 0 : i32
    %c0_i32_1 = arith.constant 0 : i32
    return %c0_i32, %c0_i32_0 : i32, i32
  }
  func.func @transform_6(%arg0: i32) -> (i32, i32) {
    %c0_i32 = arith.constant 0 : i32
    %c0_i32_0 = arith.constant 0 : i32
    %c0_i32_1 = arith.constant 0 : i32
    return %c0_i32, %c0_i32_0 : i32, i32
  }
  func.func @transform_7(%arg0: i32) -> (i32, i32) {
    %c0_i32 = arith.constant 0 : i32
    %c0_i32_0 = arith.constant 0 : i32
    %c0_i32_1 = arith.constant 0 : i32
    return %c0_i32, %c0_i32_0 : i32, i32
  }
  func.func @transform_8(%arg0: i32) -> (i32, i32) {
    %c0_i32 = arith.constant 0 : i32
    %c0_i32_0 = arith.constant 0 : i32
    return %arg0, %c0_i32 : i32, i32
  }
}

</mosaic_0001>

<bundles_post_ra>
// kernel: tpu_custom_call.1
= control target key start
LH: loop header
LB: loop body
LE: loop exit
PB: predicated region body
PF: predicated region fallthrough
CT: control target
= control target key end

     0   :  { %13 = vsyncpa [#allocation3], 0  ;;  %s4031_s0 = inlined_call_operand.vmem [shape: s32[64,1], index: 0, kind: input, shape index: {}]   ;;  %s4032_s1 = inlined_call_operand.hbm [shape: bf16[128,384], index: 1, kind: input, shape index: {}]   ;;  %s4033_s2 = inlined_call_operand.vmem [shape: f32[1,384], index: 2, kind: input, shape index: {}]   ;;  %s4034_s3 = inlined_call_operand.vmem [shape: bf16[128,128], index: 3, kind: input, shape index: {}]   ;;  %s4035_s4 = inlined_call_operand.vmem [shape: f32[1,128], index: 4, kind: input, shape index: {}]   ;;  %s4036_s5 = inlined_call_operand.hbm [shape: bf16[512,128], index: 5, kind: input, shape index: {}]   ;;  %s4037_s6 = inlined_call_operand.hbm [shape: bf16[512,128], index: 6, kind: input, shape index: {}]   ;;  %s4038_s7 = inlined_call_operand.vmem [shape: f32[1,128], index: 7, kind: input, shape index: {}]   ;;  %s4039_s8 = inlined_call_operand.hbm [shape: f32[16,128], index: 8, kind: output, shape index: {}]  }
   0x1   :  { %14 = vsyncpa [#allocation6], 0 }
   0x2   :  { %15 = vsyncpa [#allocation4], 0  ;;  %s3068_s27 = smov [#allocation5]   ;;  %s2974_s9 = scalar_lea.hbm %s4036_s5, 4096 }
   0x3   :  { %s41_s28 = sshll.u32 %s3068_s27, 4  ;;  %p2975_p0 = scmp.ne.s32.totalorder %s4036_s5, %s2974_s9  ;;  %s42_s28 = int_to_ptr.vmem [resolvable:$true] %s41_s28 }
   0x4   :  { %p2978_p1 = scmp.lt.u32.totalorder %s2974_s9, %s4036_s5 }
   0x6   :  { %p2980_p2 = pnand %p2978_p1, %p2975_p0 }
   0x8   :  { %2983 = shalt.err (!%p2980_p2)
}
   0x9   :  { %s2984_s14 = scalar_lea.vmem %s42_s28, 4096  ;;  %p2989_p4 = scmp.lt.s32.totalorder %s42_s28, %s42_s28 }
   0xa   :  { %p2985_p3 = scmp.ne.s32.totalorder %s42_s28, %s2984_s14  ;;  %p2990_p5 = scmp.lt.s32.totalorder %s2984_s14, %s2984_s14 }
   0xc   :  { %p2991_p6 = por %p2990_p5, %p2989_p4 }
   0xe   :  { %p2992_p7 = pnand %p2991_p6, %p2985_p3 }
  0x10   :  { %2995 = shalt.err (!%p2992_p7)
}
  0x11   :  { %s3069_s15 = smov 64   ;;  %s3070_s16 = smov 4  }
  0x12   :  { %47 = dma.hbm_to_vmem [thread:$0]  %s4036_s5, 4096, %s42_s28, [#allocation6], %s3069_s15, %s3069_s15, %s3070_s16  }
  0x13   :  { %s3071_s19 = smov [#allocation2]   ;;  %s2996_s23 = scalar_lea.hbm %s4032_s1, 3072 }
  0x14   :  { %s23_s20 = sshll.u32 %s3071_s19, 4  ;;  %p2997_p8 = scmp.ne.s32.totalorder %s4032_s1, %s2996_s23  ;;  %s24_s20 = int_to_ptr.vmem [resolvable:$true] %s23_s20 }
  0x15   :  { %p3000_p9 = scmp.lt.u32.totalorder %s2996_s23, %s4032_s1 }
  0x17   :  { %p3002_p10 = pnand %p3000_p9, %p2997_p8 }
  0x19   :  { %3005 = shalt.err (!%p3002_p10)
}
  0x1a   :  { %s3006_s29 = scalar_lea.vmem %s24_s20, 3072  ;;  %p3011_p12 = scmp.lt.s32.totalorder %s24_s20, %s24_s20 }
  0x1b   :  { %p3007_p11 = scmp.ne.s32.totalorder %s24_s20, %s3006_s29  ;;  %p3012_p13 = scmp.lt.s32.totalorder %s3006_s29, %s3006_s29 }
  0x1d   :  { %p3013_p0 = por %p3012_p13, %p3011_p12 }
  0x1f   :  { %p3014_p1 = pnand %p3013_p0, %p3007_p11 }
  0x21   :  { %3017 = shalt.err (!%p3014_p1)
}
  0x22   :  { %s3072_s5 = smov 192   ;;  %s3073_s28 = smov 12  }
  0x23   :  { %29 = dma.hbm_to_vmem [thread:$0]  %s4032_s1, 3072, %s24_s20, [#allocation3], %s3072_s5, %s3072_s5, %s3073_s28  }
  0x24   :  { %s3074_s10 = smov [#allocation7]   ;;  %s3018_s14 = scalar_lea.hbm %s4037_s6, 4096 }
  0x25   :  { %s53_s11 = sshll.u32 %s3074_s10, 4  ;;  %p3019_p2 = scmp.ne.s32.totalorder %s4037_s6, %s3018_s14  ;;  %s54_s11 = int_to_ptr.vmem [resolvable:$true] %s53_s11 }
  0x26   :  { %p3022_p3 = scmp.lt.u32.totalorder %s3018_s14, %s4037_s6 }
  0x28   :  { %p3024_p4 = pnand %p3022_p3, %p3019_p2 }
  0x2a   :  { %3027 = shalt.err (!%p3024_p4)
}
  0x2b   :  { %s3028_s22 = scalar_lea.vmem %s54_s11, 4096  ;;  %p3033_p6 = scmp.lt.s32.totalorder %s54_s11, %s54_s11 }
  0x2c   :  { %p3029_p5 = scmp.ne.s32.totalorder %s54_s11, %s3028_s22  ;;  %p3034_p7 = scmp.lt.s32.totalorder %s3028_s22, %s3028_s22 }
  0x2e   :  { %p3035_p8 = por %p3034_p7, %p3033_p6 }
  0x30   :  { %p3036_p9 = pnand %p3035_p8, %p3029_p5 }
  0x32   :  { %3039 = shalt.err (!%p3036_p9)
}
  0x33   :  { %59 = dma.hbm_to_vmem [thread:$0]  %s4037_s6, 4096, %s54_s11, [#allocation6], %s3069_s15, %s3069_s15, %s3070_s16  }
  0x34   :  { %3062 = dma.done.wait [#allocation3], 3072  }
  0x35   :  { %3063 = vsyncadd [#allocation3], 4294964224 }
  0x36   :  { %3064 = dma.done.wait [#allocation6], 8192  }
  0x37   :  { %3065 = vsyncadd [#allocation6], 4294959104  ;;  %v4040_v0 = vmov 0   ;;  %v76_v1 = vld [vmem:[%s4031_s0 + $0x10] sm:$0xff]  ;;  %v74_v2 = vld [vmem:[%s4031_s0] sm:$0xff]  ;;  %v72_v34 = vlaneseq  ;;  %vm870_vm12 = vcmask 64544  }
  0x38   :  { %2753 = vset.pattern.permute.xlu1 %v4040_v0  ;;  %2752 = vset.pattern.permute.xlu0 %v4040_v0  ;;  %v77_v3 = vld [vmem:[%s4031_s0 + $0x18] sm:$0xff]  ;;  %v75_v4 = vld [vmem:[%s4031_s0 + $0x8] sm:$0xff]  ;;  %v2806_v5 = vld [vmem:[#allocation2 + $0x4] ss:$12 sps:$4 sm:$0xff]   ;;  %v3076_v43 = vmov 1.0|1.0  }
  0x39   :  { %343 = vmatprep.mubr.bf16.mxu0 %v4040_v0  ;;  %89 = vperm.xlu1 %2753, %v76_v1   ;;  %v2808_v6 = vld [vmem:[#allocation2] ss:$12 sps:$4 sm:$0xff]   ;;  %v2809_v9 = vld [vmem:[#allocation2 + $0x8] ss:$12 sps:$4 sm:$0xff]   ;;  %v2812_v11 = vld [vmem:[#allocation2 + $0x18] ss:$12 sps:$4 sm:$0xff]  }
  0x3a   :  { %83 = vperm.xlu0 %2752, %v74_v2   ;;  %v79_v7 = vld [vmem:[%s4031_s0 + $0x28] sm:$0xff]  ;;  %v78_v8 = vld [vmem:[%s4031_s0 + $0x20] sm:$0xff]  ;;  %311 = vmatprep.subr.bf16.mxu0 %v2806_v5  ;;  %v81_v13 = vld [vmem:[%s4031_s0 + $0x38] sm:$0xff]  ;;  %v73_v37 = vand.u32 127, %v72_v34  ;;  %vm799_vm13 = vcmask 31744   ;;  %vm1727_vm14 = vcmask 523264  }
  0x3b   :  { %v2810_v10 = vld [vmem:[#allocation2 + $0x1c] ss:$12 sps:$4 sm:$0xff]   ;;  %2668 = vmatprep.subr.bf16.mxu1 %v2809_v9  ;;  %312 = vmatpush1.bf16.msra.mxu0 %v2808_v6  ;;  %v2813_v12 = vld [vmem:[#allocation2 + $0x20] ss:$12 sps:$4 sm:$0xff]   ;;  %v2817_v15 = vld [vmem:[#allocation2 + $0x38] ss:$12 sps:$4 sm:$0xff]  }
  0x3c   :  { %2669 = vmatpush3.bf16.msra.mxu1 %v2809_v9  ;;  %313 = vmatprep.subr.bf16.mxu0 %v2810_v10  ;;  %v2814_v14 = vld [vmem:[#allocation2 + $0x34] ss:$12 sps:$4 sm:$0xff]   ;;  %v2816_v17 = vld [vmem:[#allocation2 + $0x30] ss:$12 sps:$4 sm:$0xff]   ;;  %v2818_v18 = vld [vmem:[#allocation2 + $0x4c] ss:$12 sps:$4 sm:$0xff]  }
  0x3d   :  { %92 = vperm.xlu1 %2753, %v77_v3   ;;  %v80_v16 = vld [vmem:[%s4031_s0 + $0x30] sm:$0xff]  ;;  %2670 = vmatprep.subr.bf16.mxu1 %v2813_v12  ;;  %v2824_v23 = vld [vmem:[#allocation2 + $0x60] ss:$12 sps:$4 sm:$0xff]   ;;  %v2826_v24 = vld [vmem:[#allocation2 + $0x7c] ss:$12 sps:$4 sm:$0xff]   ;;  %s3085_s30 = smov [#allocation8]  }
  0x3e   :  { %86 = vperm.xlu0 %2752, %v75_v4   ;;  %v2821_v19 = vld [vmem:[#allocation2 + $0x50] ss:$12 sps:$4 sm:$0xff]   ;;  %v2820_v20 = vld [vmem:[#allocation2 + $0x48] ss:$12 sps:$4 sm:$0xff]   ;;  %v2829_v25 = vld [vmem:[#allocation2 + $0x80] ss:$12 sps:$4 sm:$0xff]  }
  0x3f   :  { %314 = vmatpush1.bf16.msra.mxu0 %v2812_v11  ;;  %v2822_v21 = vld [vmem:[#allocation2 + $0x64] ss:$12 sps:$4 sm:$0xff]   ;;  %v2825_v22 = vld [vmem:[#allocation2 + $0x68] ss:$12 sps:$4 sm:$0xff]   ;;  %v2834_v30 = vld [vmem:[#allocation2 + $0xac] ss:$12 sps:$4 sm:$0xff]  }
  0x40   :  { %2671 = vmatpush3.bf16.msra.mxu1 %v2813_v12  ;;  %315 = vmatprep.subr.bf16.mxu0 %v2814_v14  ;;  %v2828_v26 = vld [vmem:[#allocation2 + $0x78] ss:$12 sps:$4 sm:$0xff]   ;;  %v2830_v27 = vld [vmem:[#allocation2 + $0x94] ss:$12 sps:$4 sm:$0xff]   ;;  %v2832_v29 = vld [vmem:[#allocation2 + $0x90] ss:$12 sps:$4 sm:$0xff]  }
  0x41   :  { %98 = vperm.xlu1 %2753, %v79_v7   ;;  %2672 = vmatprep.subr.bf16.mxu1 %v2817_v15  ;;  %v2833_v28 = vld [vmem:[#allocation2 + $0x98] ss:$12 sps:$4 sm:$0xff]   ;;  %v2837_v31 = vld [vmem:[#allocation2 + $0xb0] ss:$12 sps:$4 sm:$0xff]   ;;  %v2836_v32 = vld [vmem:[#allocation2 + $0xa8] ss:$12 sps:$4 sm:$0xff]  }
  0x42   :  { %95 = vperm.xlu0 %2752, %v78_v8   ;;  %v3202_v33 = vld [vmem:[#allocation5 + $0x40] sm:$0xff]   ;;  %v3212_v42 = vld [vmem:[#allocation5 + $0x48] sm:$0xff]   ;;  %v3227_v48 = vld [vmem:[#allocation5 + $0x50] sm:$0xff]   ;;  %s2277_s9 = sshll.u32 %s3085_s30, 4  ;;  %s2278_s9 = int_to_ptr.vmem [resolvable:$true] %s2277_s9 }
  0x43   :  { %316 = vmatpush1.bf16.msra.mxu0 %v2816_v17  ;;  %v3210_v41 = vld [vmem:[#allocation5] sm:$0xff]   ;;  %v3222_v47 = vld [vmem:[#allocation5 + $0x8] sm:$0xff]   ;;  %v3230_v51 = vld [vmem:[#allocation5 + $0x10] sm:$0xff]   ;;  %s3040_s10 = scalar_lea.vmem %s2278_s9, 256  ;;  %p3045_p11 = scmp.lt.s32.totalorder %s2278_s9, %s2278_s9 }
  0x44   :  { %2673 = vmatpush3.bf16.msra.mxu1 %v2817_v15  ;;  %317 = vmatprep.subr.bf16.mxu0 %v2818_v18  ;;  %v3233_v52 = vld [vmem:[#allocation5 + $0x58] sm:$0xff]   ;;  %v3246_v54 = vld [vmem:[#allocation5 + $0x60] sm:$0xff]   ;;  %v3258_v58 = vld [vmem:[#allocation5 + $0x68] sm:$0xff]   ;;  %v3321_v15 = vshrl.u32 %v72_v34, 7  ;;  %p3041_p10 = scmp.ne.s32.totalorder %s2278_s9, %s3040_s10  ;;  %p3046_p12 = scmp.lt.s32.totalorder %s3040_s10, %s3040_s10 }
  0x45   :  { %104 = vperm.xlu1 %2753, %v81_v13   ;;  %2674 = vmatprep.subr.bf16.mxu1 %v2821_v19  ;;  %v3239_v53 = vld [vmem:[#allocation5 + $0x18] sm:$0xff]   ;;  %v3248_v55 = vld [vmem:[#allocation5 + $0xc0] sm:$0xff]   ;;  %v3260_v59 = vld [vmem:[#allocation5 + $0xc8] sm:$0xff]  }
  0x46   :  { %101 = vperm.xlu0 %2752, %v80_v16   ;;  %4055 = vst [vmem:[#allocation12_spill] sm:$0xff] %v3248_v55  ;;  %v3250_v56 = vld [vmem:[#allocation5 + $0x20] sm:$0xff]   ;;  %v3262_v60 = vld [vmem:[#allocation5 + $0x28] sm:$0xff]   ;;  %v3270_v62 = vld [vmem:[#allocation5 + $0x70] sm:$0xff]   ;;  %v170_v16 = vsub.s32 0, %v3321_v15  ;;  %v174_v18 = vsub.s32 1, %v3321_v15  ;;  %p3047_p13 = por %p3046_p12, %p3045_p11 }
  0x47   :  { %318 = vmatpush1.bf16.msra.mxu0 %v2820_v20  ;;  %v3252_v57 = vld [vmem:[#allocation5 + $0x80] sm:$0xff]   ;;  %v3264_v61 = vld [vmem:[#allocation5 + $0x88] sm:$0xff]   ;;  %v3272_v63 = vld [vmem:[#allocation5 + $0xd0] sm:$0xff]   ;;  %4057 = vst [vmem:[#allocation14_spill] sm:$0xff] %v3321_v15 }
  0x48   :  { %2675 = vmatpush3.bf16.msra.mxu1 %v2821_v19  ;;  %319 = vmatprep.subr.bf16.mxu0 %v2822_v21  ;;  %v3274_v1 = vld [vmem:[#allocation5 + $0x30] sm:$0xff]   ;;  %v3282_v3 = vld [vmem:[#allocation5 + $0x78] sm:$0xff]   ;;  %v3294_v7 = vld [vmem:[#allocation5 + $0xe0] sm:$0xff]   ;;  %p3048_p0 = pnand %p3047_p13, %p3041_p10 }
  0x49   :  { %2676 = vmatprep.subr.bf16.mxu1 %v2825_v22  ;;  %v3276_v2 = vld [vmem:[#allocation5 + $0x90] sm:$0xff]   ;;  %v3284_v4 = vld [vmem:[#allocation5 + $0xd8] sm:$0xff]   ;;  %v3297_v8 = vld [vmem:[#allocation5 + $0xa0] sm:$0xff]  }
  0x4a   :  { %v3286_v5 = vld [vmem:[#allocation5 + $0x38] sm:$0xff]   ;;  %v3301_v9 = vld [vmem:[#allocation5 + $0xe8] sm:$0xff]   ;;  %v3307_v11 = vld [vmem:[#allocation5 + $0xf0] sm:$0xff]  }
  0x4b   :  { %320 = vmatpush1.bf16.msra.mxu0 %v2824_v23  ;;  %v3288_v6 = vld [vmem:[#allocation5 + $0x98] sm:$0xff]   ;;  %v3303_v10 = vld [vmem:[#allocation5 + $0xa8] sm:$0xff]   ;;  %v3309_v12 = vld [vmem:[#allocation5 + $0xb0] sm:$0xff]  }
  0x4c   :  { %2677 = vmatpush3.bf16.msra.mxu1 %v2825_v22  ;;  %321 = vmatprep.subr.bf16.mxu0 %v2826_v24  ;;  %v3313_v13 = vld [vmem:[#allocation5 + $0xf8] sm:$0xff]   ;;  %v3327_v17 = vld [vmem:[%s4033_s2] sm:$0x7]  ;;  %s3078_s2 = smov 124  }
  0x4d   :  { %2678 = vmatprep.subr.bf16.mxu1 %v2829_v25  ;;  %v3315_v14 = vld [vmem:[#allocation5 + $0xb8] sm:$0xff]   ;;  %4058 = vst [vmem:[#allocation15_spill] sm:$0xff] %v3327_v17  ;;  %v3331_v19 = vrot.slane %v3327_v17, %v170_v16  ;;  %v3334_v20 = vrot.slane %v3327_v17, %v174_v18 }
  0x4e   :  { %4056 = vst [vmem:[#allocation13_spill] sm:$0xff] %v3315_v14 }
  0x4f   :  { %322 = vmatpush1.bf16.msra.mxu0 %v2828_v26 }
  0x50   :  { %2679 = vmatpush3.bf16.msra.mxu1 %v2829_v25  ;;  %323 = vmatprep.subr.bf16.mxu0 %v2830_v27 }
  0x51   :  { %2680 = vmatprep.subr.bf16.mxu1 %v2833_v28 }
  0x53   :  { %324 = vmatpush1.bf16.msra.mxu0 %v2832_v29 }
  0x54   :  { %2681 = vmatpush3.bf16.msra.mxu1 %v2833_v28  ;;  %325 = vmatprep.subr.bf16.mxu0 %v2834_v30 }
  0x55   :  { %2682 = vmatprep.subr.bf16.mxu1 %v2837_v31 }
  0x57   :  { %326 = vmatpush1.bf16.msra.mxu0 %v2836_v32 }
  0x58   :  { %2683 = vmatpush3.bf16.msra.mxu1 %v2837_v31  ;;  %2432 = vmatprep.subr.bf16.mxu0 %v3202_v33 }
  0x59   :  { %2454 = vmatprep.subr.bf16.mxu1 %v3248_v55 }
  0xb8   :  { %v90_v35 = vpop.permute.xlu1 %89 }
  0xb9   :  { %v84_v36 = vpop.permute.xlu0 %83  ;;  %vm108_vm0 = vcmp.eq.s32.totalorder %v90_v35, %v73_v37 }
  0xba   :  { %vm106_vm3 = vcmp.eq.s32.totalorder %v84_v36, %v73_v37 }
  0xbc   :  { %v93_v38 = vpop.permute.xlu1 %92 }
  0xbd   :  { %v87_v39 = vpop.permute.xlu0 %86  ;;  %vm109_vm1 = vcmp.eq.s32.totalorder %v93_v38, %v73_v37 }
  0xbe   :  { %vm107_vm2 = vcmp.eq.s32.totalorder %v87_v39, %v73_v37  ;;  %vm3206_vm4 = vmpackc.low %vm109_vm1, %vm108_vm0 }
  0xbf   :  { %vm2322_vm5 = vmpackc.low %vm107_vm2, %vm106_vm3 }
  0xc0   :  { %2323 = vmatmul.mubr.msk.bf16.vlgmr.msra.gmra.mrb[0].mxu0 %vm2322_vm5, %v3076_v43  ;;  %2684 = vmatprep.mubr.msk.bf16.mxu1 %vm2322_vm5, %v3076_v43  ;;  %v99_v44 = vpop.permute.xlu1 %98 }
  0xc1   :  { %v96_v45 = vpop.permute.xlu0 %95  ;;  %vm111_vm6 = vcmp.eq.s32.totalorder %v99_v44, %v73_v37  ;;  %2685 = vmatmul.mubr.msk.bf16.vlgmr.msra.gmra.mrb[0].mxu1 %vm3206_vm4, %v3076_v43  ;;  %353 = vmatprep.mubr.bf16.mxu0 %v4040_v0 }
  0xc2   :  { %vm110_vm7 = vcmp.eq.s32.totalorder %v96_v45, %v73_v37  ;;  %2433 = vmatpush3.bf16.msra.mxu0 %v3210_v41  ;;  %2455 = vmatpush3.bf16.msra.mxu1 %v3252_v57 }
  0xc3   :  { %vm3217_vm8 = vmpackc.low %vm111_vm6, %vm110_vm7  ;;  %2434 = vmatprep.subr.bf16.mxu0 %v3212_v42  ;;  %2456 = vmatprep.subr.bf16.mxu1 %v3260_v59 }
  0xc4   :  { %2688 = vmatprep.mubr.msk.bf16.mxu1 %vm3217_vm8, %v3076_v43  ;;  %v105_v49 = vpop.permute.xlu1 %104 }
  0xc5   :  { %v102_v50 = vpop.permute.xlu0 %101  ;;  %vm113_vm9 = vcmp.eq.s32.totalorder %v105_v49, %v73_v37 }
  0xc6   :  { %vm112_vm10 = vcmp.eq.s32.totalorder %v102_v50, %v73_v37  ;;  %2435 = vmatpush3.bf16.msra.mxu0 %v3222_v47  ;;  %2457 = vmatpush3.bf16.msra.mxu1 %v3264_v61 }
  0xc7   :  { %vm2328_vm11 = vmpackc.low %vm113_vm9, %vm112_vm10  ;;  %2436 = vmatprep.subr.bf16.mxu0 %v3227_v48  ;;  %2458 = vmatprep.subr.bf16.mxu1 %v3272_v63 }
  0xc8   :  { %2325 = vmatmul.mubr.msk.bf16.gmra.mrb[4].mxu0 %vm3206_vm4, %v3076_v43 }
  0xc9   :  { %2689 = vmatmul.mubr.msk.bf16.gmra.mrb[4].mxu1 %vm2328_vm11, %v3076_v43  ;;  %363 = vmatprep.mubr.bf16.mxu0 %v4040_v0 }
  0xca   :  { %2437 = vmatpush3.bf16.msra.mxu0 %v3230_v51  ;;  %2459 = vmatpush3.bf16.msra.mxu1 %v3276_v2 }
  0xcb   :  { %2438 = vmatprep.subr.bf16.mxu0 %v3233_v52  ;;  %2460 = vmatprep.subr.bf16.mxu1 %v3284_v4 }
  0xce   :  { %2439 = vmatpush3.bf16.msra.mxu0 %v3239_v53  ;;  %2461 = vmatpush3.bf16.msra.mxu1 %v3288_v6 }
  0xcf   :  { %2440 = vmatprep.subr.bf16.mxu0 %v3246_v54  ;;  %2462 = vmatprep.subr.bf16.mxu1 %v3294_v7 }
  0xd0   :  { %2327 = vmatmul.mubr.msk.bf16.gmra.mrb[8].mxu0 %vm3217_vm8, %v3076_v43 }
  0xd1   :  { %373 = vmatprep.mubr.bf16.mxu0 %v4040_v0 }
  0xd2   :  { %2441 = vmatpush3.bf16.msra.mxu0 %v3250_v56  ;;  %2463 = vmatpush3.bf16.msra.mxu1 %v3297_v8 }
  0xd3   :  { %2442 = vmatprep.subr.bf16.mxu0 %v3258_v58  ;;  %2464 = vmatprep.subr.bf16.mxu1 %v3301_v9 }
  0xd6   :  { %2443 = vmatpush3.bf16.msra.mxu0 %v3262_v60  ;;  %2465 = vmatpush3.bf16.msra.mxu1 %v3303_v10 }
  0xd7   :  { %2444 = vmatprep.subr.bf16.mxu0 %v3270_v62  ;;  %2466 = vmatprep.subr.bf16.mxu1 %v3307_v11 }
  0xd8   :  { %2329 = vmatmul.mubr.msk.bf16.gmra.mrb[12].mxu0 %vm2328_vm11, %v3076_v43 }
  0xda   :  { %2445 = vmatpush3.bf16.msra.mxu0 %v3274_v1  ;;  %2467 = vmatpush3.bf16.msra.mxu1 %v3309_v12 }
  0xdb   :  { %2446 = vmatprep.subr.bf16.mxu0 %v3282_v3  ;;  %2468 = vmatprep.subr.bf16.mxu1 %v3313_v13 }
  0xde   :  { %2447 = vmatpush3.bf16.msra.mxu0 %v3286_v5  ;;  %2469 = vmatpush3.bf16.msra.mxu1 %v3315_v14 }
  0xdf   :  { %2476 = vmatprep.subr.bf16.mxu0 %v3202_v33  ;;  %2498 = vmatprep.subr.bf16.mxu1 %v3248_v55 }
 0x193   :  { %v345_v21 = vpop.f32.mrb[0].mxu0 }
 0x194   :  { %v3337_v22 = vadd.f32 %v345_v21, %v3331_v19  ;;  %v347_v23 = vpop.f32.mrb[1].mxu0  ;;  %v3339_v24 = vpop.f32.mrb[0].mxu1 }
 0x195   :  { %4059 = vst [vmem:[#allocation16_spill] sm:$0xff] %v3339_v24  ;;  %v3342_v25 = vadd.f32 %v347_v23, %v3334_v20  ;;  %v349_v26 = vpop.f32.mrb[2].mxu0  ;;  %v3344_v27 = vpop.f32.mrb[1].mxu1 }
 0x196   :  { %4060 = vst [vmem:[#allocation17_spill] sm:$0xff] %v3344_v27  ;;  %v3347_v28 = vadd.f32 %v349_v26, %v3331_v19  ;;  %v351_v29 = vpop.f32.mrb[3].mxu0  ;;  %v3349_v30 = vpop.f32.mrb[2].mxu1 }
 0x197   :  { %4061 = vst [vmem:[#allocation18_spill] sm:$0xff] %v3349_v30  ;;  %v513_v31 = vmul.f32 %v3342_v25, %v3337_v22  ;;  %v3354_v32 = vadd.f32 %v351_v29, %v3334_v20  ;;  %v3356_v34 = vpop.f32.mrb[3].mxu1 }
 0x198   :  { %4062 = vst [vmem:[#allocation19_spill] sm:$0xff] %v3356_v34 }
 0x199   :  { %v514_v35 = vmul.f32 %v3354_v32, %v3347_v28 }
 0x19b   :  { %v521_v36 = vpack.c.bf16 %v514_v35, %v513_v31  ;;  %v355_v37 = vpop.f32.mrb[4].mxu0 }
 0x19c   :  { %v3361_v38 = vadd.f32 %v355_v37, %v3331_v19  ;;  %v357_v39 = vpop.f32.mrb[5].mxu0  ;;  %v3363_v40 = vpop.f32.mrb[4].mxu1 }
 0x19d   :  { %4063 = vst [vmem:[#allocation20_spill] sm:$0xff] %v3363_v40  ;;  %v358_v43 = vadd.f32 %v357_v39, %v3334_v20  ;;  %v359_v44 = vpop.f32.mrb[6].mxu0  ;;  %v3366_v45 = vpop.f32.mrb[5].mxu1 }
 0x19e   :  { %4064 = vst [vmem:[#allocation21_spill] sm:$0xff] %v3366_v45  ;;  %v3370_v46 = vmul.f32 %v3361_v38, %v3342_v25  ;;  %v3373_v49 = vadd.f32 %v359_v44, %v3331_v19  ;;  %v361_v50 = vpop.f32.mrb[7].mxu0  ;;  %v3375_v16 = vpop.f32.mrb[6].mxu1 }
 0x19f   :  { %4065 = vst [vmem:[#allocation22_spill] sm:$0xff] %v3375_v16  ;;  %v362_v18 = vadd.f32 %v361_v50, %v3334_v20  ;;  %v3378_v21 = vpop.f32.mrb[7].mxu1  ;;  %v515_v23 = vmul.f32 %v358_v43, %v3337_v22  ;;  %v949_v26 = vmul.f32 %v358_v43, %v3361_v38 }
 0x1a0   :  { %4066 = vst [vmem:[#allocation23_spill] sm:$0xff] %v3378_v21  ;;  %v3384_v29 = vmul.f32 %v3373_v49, %v3354_v32 }
 0x1a1   :  { %v516_v31 = vmul.f32 %v362_v18, %v3347_v28  ;;  %v950_v35 = vmul.f32 %v362_v18, %v3373_v49 }
 0x1a3   :  { %v365_v39 = vpop.f32.mrb[8].mxu0  ;;  %v522_v44 = vpack.c.bf16 %v516_v31, %v515_v23  ;;  %v956_v50 = vpack.c.bf16 %v950_v35, %v949_v26 }
 0x1a4   :  { %v366_v0 = vadd.f32 %v365_v39, %v3331_v19  ;;  %v367_v40 = vpop.f32.mrb[9].mxu0 }
 0x1a5   :  { %v368_v45 = vadd.f32 %v367_v40, %v3334_v20  ;;  %v369_v27 = vpop.f32.mrb[10].mxu0  ;;  %749 = vmatprep.mubr.bf16.mxu0 %v522_v44 }
 0x1a6   :  { %v3393_v24 = vmul.f32 %v366_v0, %v3342_v25  ;;  %v370_v16 = vadd.f32 %v369_v27, %v3331_v19  ;;  %v371_v21 = vpop.f32.mrb[11].mxu0  ;;  %750 = vmatmul.mubr.bf16.vlgmr.msra.gmra.mrb[16].mxu0 %v521_v36  ;;  %v3396_v34 = vmul.f32 %v366_v0, %v358_v43 }
 0x1a7   :  { %v517_v37 = vmul.f32 %v368_v45, %v3337_v22  ;;  %v3400_v23 = vmul.f32 %v368_v45, %v3361_v38  ;;  %v3402_v26 = vmul.f32 %v368_v45, %v366_v0  ;;  %v372_v40 = vadd.f32 %v371_v21, %v3334_v20  ;;  %2477 = vmatpush3.bf16.msra.mxu0 %v3210_v41 }
 0x1a8   :  { %4067 = vst [vmem:[#allocation24_spill] sm:$0xff] %v3393_v24  ;;  %v3407_v31 = vmul.f32 %v370_v16, %v3354_v32  ;;  %991 = vmatprep.mubr.bf16.mxu0 %v956_v50  ;;  %2478 = vmatprep.subr.bf16.mxu0 %v3212_v42  ;;  %v3410_v27 = vmul.f32 %v370_v16, %v362_v18 }
 0x1a9   :  { %4068 = vst [vmem:[#allocation25_spill] sm:$0xff] %v3402_v26  ;;  %v518_v36 = vmul.f32 %v372_v40, %v3347_v28  ;;  %v3414_v35 = vmul.f32 %v372_v40, %v3373_v49  ;;  %v3416_v39 = vmul.f32 %v372_v40, %v370_v16 }
 0x1aa   :  { %v1196_v21 = vpack.c.bf16 %v3410_v27, %v3396_v34 }
 0x1ab   :  { %4069 = vst [vmem:[#allocation26_spill] sm:$0xff] %v3416_v39  ;;  %v523_v30 = vpack.c.bf16 %v518_v36, %v517_v37  ;;  %2479 = vmatpush3.bf16.msra.mxu0 %v3222_v47  ;;  %v375_v50 = vpop.f32.mrb[12].mxu0 }
 0x1ac   :  { %v376_v55 = vadd.f32 %v375_v50, %v3331_v19  ;;  %v377_v14 = vpop.f32.mrb[13].mxu0  ;;  %2480 = vmatprep.subr.bf16.mxu0 %v3227_v48 }
 0x1ad   :  { %v378_v34 = vadd.f32 %v377_v14, %v3334_v20  ;;  %v379_v27 = vpop.f32.mrb[14].mxu0 }
 0x1ae   :  { %v3431_v44 = vmul.f32 %v376_v55, %v3342_v25  ;;  %v3433_v37 = vmul.f32 %v376_v55, %v368_v45  ;;  %v380_v36 = vadd.f32 %v379_v27, %v3331_v19  ;;  %v381_v24 = vpop.f32.mrb[15].mxu0  ;;  %v3436_v17 = vmul.f32 %v376_v55, %v358_v43 }
 0x1af   :  { %v382_v15 = vadd.f32 %v381_v24, %v3334_v20  ;;  %2481 = vmatpush3.bf16.msra.mxu0 %v3230_v51  ;;  %v519_v50 = vmul.f32 %v378_v34, %v3337_v22  ;;  %v953_v26 = vmul.f32 %v378_v34, %v3361_v38  ;;  %v1193_v14 = vmul.f32 %v378_v34, %v366_v0 }
 0x1b0   :  { %v3443_v39 = vmul.f32 %v380_v36, %v3354_v32  ;;  %v3445_v25 = vmul.f32 %v380_v36, %v372_v40  ;;  %2482 = vmatprep.subr.bf16.mxu0 %v3233_v52  ;;  %v3448_v19 = vmul.f32 %v380_v36, %v362_v18  ;;  %v3450_v43 = vmul.f32 %v378_v34, %v376_v55 }
 0x1b1   :  { %v520_v20 = vmul.f32 %v382_v15, %v3347_v28  ;;  %v954_v24 = vmul.f32 %v382_v15, %v3373_v49  ;;  %v1194_v45 = vmul.f32 %v382_v15, %v370_v16  ;;  %v3454_v22 = vmul.f32 %v382_v15, %v380_v36  ;;  %v4074_v16 = vld [vmem:[#allocation24_spill] sm:$0xff] }
 0x1b2   :  { %v1436_v0 = vpack.c.bf16 %v3448_v19, %v3436_v17  ;;  %v1435_v32 = vpack.c.bf16 %v3443_v39, %v3431_v44  ;;  %v1437_v38 = vpack.c.bf16 %v3445_v25, %v3433_v37  ;;  %v4070_v15 = vpack.c.bf16 %v3384_v29, %v3370_v46  ;;  %v4072_v46 = vld [vmem:[#allocation12_spill] sm:$0xff] }
 0x1b3   :  { %2483 = vmatpush3.bf16.msra.mxu0 %v3239_v53  ;;  %v524_v55 = vpack.c.bf16 %v520_v20, %v519_v50  ;;  %v958_v18 = vpack.c.bf16 %v954_v24, %v953_v26  ;;  %v1198_v40 = vpack.c.bf16 %v1194_v45, %v1193_v14  ;;  %v1438_v28 = vpack.c.bf16 %v3454_v22, %v3450_v43 }
 0x1b4   :  { %2484 = vmatprep.subr.bf16.mxu0 %v3246_v54  ;;  %v4073_v49 = vpack.c.bf16 %v3414_v35, %v3400_v23  ;;  %v4075_v29 = vpack.c.bf16 %v3407_v31, %v4074_v16 }
 0x1b5   :  { %790 = vmatprep.mubr.bf16.mxu1 %v524_v55 }
 0x1b6   :  { %791 = vmatmul.mubr.bf16.vlgmr.msra.gmra.mrb[8].mxu1 %v523_v30  ;;  %v4071_v30 = vld [vmem:[#allocation13_spill] sm:$0xff] }
 0x1b7   :  { %2485 = vmatpush3.bf16.msra.mxu0 %v3250_v56  ;;  %2499 = vmatpush3.bf16.msra.mxu1 %v3252_v57 }
 0x1b8   :  { %1032 = vmatprep.mubr.bf16.mxu1 %v958_v18  ;;  %2486 = vmatprep.subr.bf16.mxu0 %v3258_v58 }
 0x1b9   :  { %2500 = vmatprep.subr.bf16.mxu1 %v3260_v59 }
 0x1bb   :  { %2487 = vmatpush3.bf16.msra.mxu0 %v3262_v60  ;;  %2501 = vmatpush3.bf16.msra.mxu1 %v3264_v61 }
 0x1bc   :  { %2488 = vmatprep.subr.bf16.mxu0 %v3270_v62  ;;  %2502 = vmatprep.subr.bf16.mxu1 %v3272_v63 }
 0x1bf   :  { %2489 = vmatpush3.bf16.msra.mxu0 %v3274_v1  ;;  %2503 = vmatpush3.bf16.msra.mxu1 %v3276_v2 }
 0x1c0   :  { %2490 = vmatprep.subr.bf16.mxu0 %v3282_v3  ;;  %2504 = vmatprep.subr.bf16.mxu1 %v3284_v4 }
 0x1c3   :  { %2491 = vmatpush3.bf16.msra.mxu0 %v3286_v5  ;;  %2505 = vmatpush3.bf16.msra.mxu1 %v3288_v6 }
 0x1c4   :  { %2506 = vmatprep.subr.bf16.mxu1 %v3294_v7  ;;  %2520 = vmatprep.subr.bf16.mxu0 %v3202_v33 }
 0x1c6   :  { %992 = vmatmul.mubr.bf16.vlgmr.msra.gmra.mrb[20].mxu0 %v4070_v15 }
 0x1c7   :  { %2507 = vmatpush3.bf16.msra.mxu1 %v3297_v8  ;;  %2521 = vmatpush3.bf16.msra.mxu0 %v3210_v41 }
 0x1c8   :  { %1231 = vmatprep.mubr.bf16.mxu0 %v1196_v21  ;;  %2508 = vmatprep.subr.bf16.mxu1 %v3301_v9  ;;  %v3077_v21 = vmov 4  }
 0x1c9   :  { %2522 = vmatprep.subr.bf16.mxu0 %v3212_v42  ;;  %2754 = vset.pattern.permute.xlu1 %v3077_v21 }
 0x1cb   :  { %2509 = vmatpush3.bf16.msra.mxu1 %v3303_v10  ;;  %2523 = vmatpush3.bf16.msra.mxu0 %v3222_v47 }
 0x1cc   :  { %2510 = vmatprep.subr.bf16.mxu1 %v3307_v11  ;;  %2524 = vmatprep.subr.bf16.mxu0 %v3227_v48 }
 0x1cf   :  { %2511 = vmatpush3.bf16.msra.mxu1 %v3309_v12  ;;  %2525 = vmatpush3.bf16.msra.mxu0 %v3230_v51 }
 0x1d0   :  { %2512 = vmatprep.subr.bf16.mxu1 %v3313_v13  ;;  %2526 = vmatprep.subr.bf16.mxu0 %v3233_v52 }
 0x1d3   :  { %2513 = vmatpush3.bf16.msra.mxu1 %v4071_v30  ;;  %2527 = vmatpush3.bf16.msra.mxu0 %v3239_v53 }
 0x1d4   :  { %2528 = vmatprep.subr.bf16.mxu0 %v3246_v54  ;;  %2542 = vmatprep.subr.bf16.mxu1 %v4072_v46 }
 0x1d6   :  { %1033 = vmatmul.mubr.bf16.vlgmr.msra.gmra.mrb[12].mxu1 %v4073_v49 }
 0x1d7   :  { %2529 = vmatpush3.bf16.msra.mxu0 %v3250_v56  ;;  %2543 = vmatpush3.bf16.msra.mxu1 %v3252_v57 }
 0x1d8   :  { %1272 = vmatprep.mubr.bf16.mxu1 %v1198_v40  ;;  %2530 = vmatprep.subr.bf16.mxu0 %v3258_v58 }
 0x1d9   :  { %2544 = vmatprep.subr.bf16.mxu1 %v3260_v59 }
 0x1db   :  { %2531 = vmatpush3.bf16.msra.mxu0 %v3262_v60  ;;  %2545 = vmatpush3.bf16.msra.mxu1 %v3264_v61 }
 0x1dc   :  { %2532 = vmatprep.subr.bf16.mxu0 %v3270_v62  ;;  %2546 = vmatprep.subr.bf16.mxu1 %v3272_v63 }
 0x1df   :  { %2533 = vmatpush3.bf16.msra.mxu0 %v3274_v1  ;;  %2547 = vmatpush3.bf16.msra.mxu1 %v3276_v2 }
 0x1e0   :  { %2534 = vmatprep.subr.bf16.mxu0 %v3282_v3  ;;  %2548 = vmatprep.subr.bf16.mxu1 %v3284_v4 }
 0x1e3   :  { %2535 = vmatpush3.bf16.msra.mxu0 %v3286_v5  ;;  %2549 = vmatpush3.bf16.msra.mxu1 %v3288_v6 }
 0x1e4   :  { %2550 = vmatprep.subr.bf16.mxu1 %v3294_v7  ;;  %2564 = vmatprep.subr.bf16.mxu0 %v3202_v33  ;;  %v4076_v33 = vld [vmem:[#allocation26_spill] sm:$0xff] }
 0x1e6   :  { %1232 = vmatmul.mubr.bf16.vlgmr.msra.gmra.mrb[24].mxu0 %v4075_v29 }
 0x1e7   :  { %2551 = vmatpush3.bf16.msra.mxu1 %v3297_v8  ;;  %2565 = vmatpush3.bf16.msra.mxu0 %v3210_v41  ;;  %v4077_v41 = vld [vmem:[#allocation25_spill] sm:$0xff] }
 0x1e8   :  { %1471 = vmatprep.mubr.bf16.mxu0 %v1436_v0  ;;  %2552 = vmatprep.subr.bf16.mxu1 %v3301_v9 }
 0x1e9   :  { %2566 = vmatprep.subr.bf16.mxu0 %v3212_v42  ;;  %v4078_v42 = vpack.c.bf16 %v4076_v33, %v4077_v41 }
 0x1eb   :  { %2553 = vmatpush3.bf16.msra.mxu1 %v3303_v10  ;;  %2567 = vmatpush3.bf16.msra.mxu0 %v3222_v47 }
 0x1ec   :  { %2554 = vmatprep.subr.bf16.mxu1 %v3307_v11  ;;  %2568 = vmatprep.subr.bf16.mxu0 %v3227_v48 }
 0x1ef   :  { %2555 = vmatpush3.bf16.msra.mxu1 %v3309_v12  ;;  %2569 = vmatpush3.bf16.msra.mxu0 %v3230_v51 }
 0x1f0   :  { %2556 = vmatprep.subr.bf16.mxu1 %v3313_v13  ;;  %2570 = vmatprep.subr.bf16.mxu0 %v3233_v52 }
 0x1f3   :  { %2557 = vmatpush3.bf16.msra.mxu1 %v4071_v30  ;;  %2571 = vmatpush3.bf16.msra.mxu0 %v3239_v53 }
 0x1f4   :  { %2572 = vmatprep.subr.bf16.mxu0 %v3246_v54  ;;  %2586 = vmatprep.subr.bf16.mxu1 %v4072_v46 }
 0x1f6   :  { %1273 = vmatmul.mubr.bf16.vlgmr.msra.gmra.mrb[16].mxu1 %v4078_v42 }
 0x1f7   :  { %2573 = vmatpush3.bf16.msra.mxu0 %v3250_v56  ;;  %2587 = vmatpush3.bf16.msra.mxu1 %v3252_v57 }
 0x1f8   :  { %1512 = vmatprep.mubr.bf16.mxu1 %v1438_v28  ;;  %2574 = vmatprep.subr.bf16.mxu0 %v3258_v58 }
 0x1f9   :  { %2588 = vmatprep.subr.bf16.mxu1 %v3260_v59 }
 0x1fb   :  { %2575 = vmatpush3.bf16.msra.mxu0 %v3262_v60  ;;  %2589 = vmatpush3.bf16.msra.mxu1 %v3264_v61 }
 0x1fc   :  { %2576 = vmatprep.subr.bf16.mxu0 %v3270_v62  ;;  %2590 = vmatprep.subr.bf16.mxu1 %v3272_v63 }
 0x1ff   :  { %2577 = vmatpush3.bf16.msra.mxu0 %v3274_v1  ;;  %2591 = vmatpush3.bf16.msra.mxu1 %v3276_v2 }
 0x200   :  { %2578 = vmatprep.subr.bf16.mxu0 %v3282_v3  ;;  %2592 = vmatprep.subr.bf16.mxu1 %v3284_v4 }
 0x203   :  { %2579 = vmatpush3.bf16.msra.mxu0 %v3286_v5  ;;  %2593 = vmatpush3.bf16.msra.mxu1 %v3288_v6 }
 0x204   :  { %2594 = vmatprep.subr.bf16.mxu1 %v3294_v7 }
 0x206   :  { %1472 = vmatmul.mubr.bf16.vlgmr.msra.gmra.mrb[28].mxu0 %v1435_v32 }
 0x207   :  { %2595 = vmatpush3.bf16.msra.mxu1 %v3297_v8 }
 0x208   :  { %2596 = vmatprep.subr.bf16.mxu1 %v3301_v9 }
 0x20b   :  { %2597 = vmatpush3.bf16.msra.mxu1 %v3303_v10 }
 0x20c   :  { %2598 = vmatprep.subr.bf16.mxu1 %v3307_v11 }
 0x20f   :  { %2599 = vmatpush3.bf16.msra.mxu1 %v3309_v12 }
 0x210   :  { %2600 = vmatprep.subr.bf16.mxu1 %v3313_v13 }
 0x213   :  { %2601 = vmatpush3.bf16.msra.mxu1 %v4071_v30 }
 0x216   :  { %1513 = vmatmul.mubr.bf16.vlgmr.msra.gmra.mrb[20].mxu1 %v1437_v38 }
 0x279   :  { %v2448_v47 = vpop.f32.mrb[16].mxu0 }
 0x27a   :  { %v2449_v48 = vpop.f32.mrb[17].mxu0 }
 0x27b   :  { %v2450_v51 = vadd.f32 %v2449_v48, %v2448_v47  ;;  %v2451_v52 = vpop.f32.mrb[18].mxu0 }
 0x27c   :  { %v2452_v53 = vpop.f32.mrb[19].mxu0 }
 0x27d   :  { %v2453_v54 = vadd.f32 %v2452_v53, %v2451_v52 }
 0x289   :  { %v2470_v56 = vpop.f32.mrb[8].mxu1 }
 0x28a   :  { %v2471_v57 = vpop.f32.mrb[9].mxu1 }
 0x28b   :  { %v2472_v58 = vadd.f32 %v2471_v57, %v2470_v56  ;;  %v2473_v59 = vpop.f32.mrb[10].mxu1 }
 0x28c   :  { %v2474_v60 = vpop.f32.mrb[11].mxu1 }
 0x28d   :  { %v3576_v61 = vadd.f32 %v2472_v58, %v2450_v51  ;;  %v2475_v62 = vadd.f32 %v2474_v60, %v2473_v59 }
 0x28f   :  { %v3578_v63 = vadd.f32 %v2475_v62, %v2453_v54  ;;  %v871_v1 = vsel %vm870_vm12, %v3576_v61, -inf  ;;  %v800_v2 = vsel %vm799_vm13, %v3576_v61, -inf }
 0x290   :  { %872 = vmax.xlane.f32.xlu0 %v871_v1  ;;  %801 = vmax.xlane.f32.xlu1 %v800_v2 }
 0x291   :  { %v803_v3 = vsel %vm799_vm13, %v3578_v63, -inf  ;;  %v874_v4 = vsel %vm870_vm12, %v3578_v63, -inf }
 0x294   :  { %804 = vmax.xlane.f32.xlu0 %v803_v3  ;;  %875 = vmax.xlane.f32.xlu1 %v874_v4 }
 0x299   :  { %v2492_v5 = vpop.f32.mrb[20].mxu0 }
 0x29a   :  { %v2493_v6 = vpop.f32.mrb[21].mxu0 }
 0x29b   :  { %v2494_v7 = vadd.f32 %v2493_v6, %v2492_v5  ;;  %v2495_v8 = vpop.f32.mrb[22].mxu0 }
 0x29c   :  { %v2496_v9 = vpop.f32.mrb[23].mxu0 }
 0x29d   :  { %v2497_v10 = vadd.f32 %v2496_v9, %v2495_v8 }
 0x2a9   :  { %v2514_v11 = vpop.f32.mrb[12].mxu1 }
 0x2aa   :  { %v2515_v12 = vpop.f32.mrb[13].mxu1 }
 0x2ab   :  { %v2516_v13 = vadd.f32 %v2515_v12, %v2514_v11  ;;  %v2517_v17 = vpop.f32.mrb[14].mxu1  ;;  %v3081_v11 = vmov 6  }
 0x2ac   :  { %v2518_v23 = vpop.f32.mrb[15].mxu1 }
 0x2ad   :  { %v3588_v26 = vadd.f32 %v2516_v13, %v2494_v7  ;;  %v2519_v31 = vadd.f32 %v2518_v23, %v2517_v17  ;;  %v3082_v17 = vmov 1  }
 0x2af   :  { %v3590_v35 = vadd.f32 %v2519_v31, %v2497_v10  ;;  %v1111_v39 = vsel %vm870_vm12, %v3588_v26, -inf  ;;  %v1041_v34 = vsel %vm799_vm13, %v3588_v26, -inf  ;;  %v3080_v10 = vmov 7  }
 0x2b0   :  { %1112 = vmax.xlane.f32.xlu0 %v1111_v39  ;;  %v3083_v31 = vmov 2   ;;  %v4079_v39 = vmov 0  }
 0x2b1   :  { %v1044_v44 = vsel %vm799_vm13, %v3590_v35, -inf  ;;  %v1114_v27 = vsel %vm870_vm12, %v3590_v35, -inf }
 0x2b2   :  { %1045 = vmax.xlane.f32.xlu1 %v1044_v44 }
 0x2b4   :  { %1042 = vmax.xlane.f32.xlu0 %v1041_v34 }
 0x2b8   :  { %1115 = vmax.xlane.f32.xlu0 %v1114_v27 }
 0x2b9   :  { %v2536_v37 = vpop.f32.mrb[24].mxu0 }
 0x2ba   :  { %v2537_v36 = vpop.f32.mrb[25].mxu0 }
 0x2bb   :  { %v2538_v50 = vadd.f32 %v2537_v36, %v2536_v37  ;;  %v2539_v14 = vpop.f32.mrb[26].mxu0 }
 0x2bc   :  { %v2540_v25 = vpop.f32.mrb[27].mxu0 }
 0x2bd   :  { %v2541_v19 = vadd.f32 %v2540_v25, %v2539_v14 }
 0x2c9   :  { %v2558_v43 = vpop.f32.mrb[16].mxu1 }
 0x2ca   :  { %v2559_v20 = vpop.f32.mrb[17].mxu1 }
 0x2cb   :  { %v2560_v24 = vadd.f32 %v2559_v20, %v2558_v43  ;;  %v2561_v45 = vpop.f32.mrb[18].mxu1 }
 0x2cc   :  { %v2562_v22 = vpop.f32.mrb[19].mxu1 }
 0x2cd   :  { %v3601_v0 = vadd.f32 %v2560_v24, %v2538_v50  ;;  %v2563_v32 = vadd.f32 %v2562_v22, %v2561_v45 }
 0x2cf   :  { %v3603_v38 = vadd.f32 %v2563_v32, %v2541_v19  ;;  %v1281_v55 = vsel %vm799_vm13, %v3601_v0, -inf  ;;  %v1351_v18 = vsel %vm870_vm12, %v3601_v0, -inf }
 0x2d0   :  { %1282 = vmax.xlane.f32.xlu0 %v1281_v55  ;;  %1352 = vmax.xlane.f32.xlu1 %v1351_v18 }
 0x2d1   :  { %v1354_v40 = vsel %vm870_vm12, %v3603_v38, -inf  ;;  %v1284_v28 = vsel %vm799_vm13, %v3603_v38, -inf }
 0x2d4   :  { %1355 = vmax.xlane.f32.xlu0 %v1354_v40 }
 0x2d8   :  { %1285 = vmax.xlane.f32.xlu0 %v1284_v28 }
 0x2d9   :  { %v2580_v15 = vpop.f32.mrb[28].mxu0 }
 0x2da   :  { %v2581_v30 = vpop.f32.mrb[29].mxu0 }
 0x2db   :  { %v2582_v46 = vadd.f32 %v2581_v30, %v2580_v15  ;;  %v2583_v49 = vpop.f32.mrb[30].mxu0 }
 0x2dc   :  { %v2584_v16 = vpop.f32.mrb[31].mxu0 }
 0x2dd   :  { %v2585_v29 = vadd.f32 %v2584_v16, %v2583_v49 }
 0x2e9   :  { %v2602_v33 = vpop.f32.mrb[20].mxu1 }
 0x2ea   :  { %v2603_v41 = vpop.f32.mrb[21].mxu1 }
 0x2eb   :  { %v2604_v42 = vadd.f32 %v2603_v41, %v2602_v33  ;;  %v2605_v47 = vpop.f32.mrb[22].mxu1 }
 0x2ec   :  { %v2606_v48 = vpop.f32.mrb[23].mxu1 }
 0x2ed   :  { %v3613_v51 = vadd.f32 %v2604_v42, %v2582_v46  ;;  %v2607_v52 = vadd.f32 %v2606_v48, %v2605_v47 }
 0x2ef   :  { %v3615_v53 = vadd.f32 %v2607_v52, %v2585_v29  ;;  %v1591_v54 = vsel %vm870_vm12, %v3613_v51, -inf  ;;  %v1521_v57 = vsel %vm799_vm13, %v3613_v51, -inf }
 0x2f0   :  { %1592 = vmax.xlane.f32.xlu1 %v1591_v54 }
 0x2f1   :  { %v1594_v56 = vsel %vm870_vm12, %v3615_v53, -inf  ;;  %v1524_v58 = vsel %vm799_vm13, %v3615_v53, -inf }
 0x2f2   :  { %1595 = vmax.xlane.f32.xlu0 %v1594_v56 }
 0x2f4   :  { %1522 = vmax.xlane.f32.xlu1 %v1521_v57 }
 0x2f6   :  { %1525 = vmax.xlane.f32.xlu0 %v1524_v58 }
 0x31d   :  { %v873_v59 = vpop.xlane.xlu0 %872  ;;  %v802_v60 = vpop.xlane.xlu1 %801 }
 0x31e   :  { %v877_v62 = vsub.f32 %v3576_v61, %v873_v59  ;;  %v806_v1 = vsub.f32 %v3576_v61, %v802_v60  ;;  %v3079_v61 = vmov 5  }
 0x320   :  { %v879_v2 = vmul.f32 1.442695, %v877_v62  ;;  %v808_v3 = vmul.f32 1.442695, %v806_v1 }
 0x321   :  { %v876_v4 = vpop.xlane.xlu1 %875  ;;  %v805_v12 = vpop.xlane.xlu0 %804 }
 0x322   :  { %2910 = vpow2.f32 %v879_v2  ;;  %v878_v5 = vsub.f32 %v3578_v63, %v876_v4  ;;  %v807_v13 = vsub.f32 %v3578_v63, %v805_v12 }
 0x323   :  { %2912 = vpow2.f32 %v808_v3 }
 0x324   :  { %v881_v6 = vmul.f32 1.442695, %v878_v5  ;;  %v810_v23 = vmul.f32 1.442695, %v807_v13 }
 0x326   :  { %2914 = vpow2.f32 %v881_v6 }
 0x327   :  { %2916 = vpow2.f32 %v810_v23 }
 0x32c   :  { %v2911_v7 = vpop.eup %2910 }
 0x32d   :  { %v3628_v8 = vpop.eup %2912  ;;  %885 = vrot.lane.b32.xlu1 %v2911_v7, %s3078_s2 }
 0x32e   :  { %822 = vperm.xlu0 %2752, %v3628_v8   ;;  %v812_v36 = vsel %vm799_vm13, %v3628_v8, 0.0 }
 0x330   :  { %v2915_v9 = vpop.eup %2914 }
 0x331   :  { %900 = vperm.xlu1 %2754, %v2911_v7   ;;  %v3645_v44 = vpop.eup %2916 }
 0x332   :  { %887 = vrot.lane.b32.xlu0 %v2915_v9, %s3078_s2  ;;  %v815_v34 = vsel %vm799_vm13, %v3645_v44, 0.0 }
 0x333   :  { %2761 = vset.pattern.permute.xlu0 %v3077_v21 }
 0x335   :  { %2755 = vset.pattern.permute.xlu1 %v3079_v61 }
 0x336   :  { %904 = vperm.xlu0 %2761, %v2915_v9   ;;  %910 = vperm.xlu1 %2755, %v2911_v7  }
 0x33a   :  { %2764 = vset.pattern.permute.xlu0 %v3080_v10  ;;  %2756 = vset.pattern.permute.xlu1 %v3081_v11 }
 0x33b   :  { %938 = vperm.xlu0 %2764, %v2915_v9   ;;  %922 = vperm.xlu1 %2756, %v2911_v7  }
 0x33d   :  { %v1113_v63 = vpop.xlane.xlu0 %1112 }
 0x33e   :  { %v1117_v27 = vsub.f32 %v3588_v26, %v1113_v63 }
 0x33f   :  { %2757 = vset.pattern.permute.xlu1 %v3080_v10  ;;  %2767 = vset.pattern.permute.xlu0 %v3081_v11  ;;  %v1046_v20 = vpop.xlane.xlu1 %1045 }
 0x340   :  { %934 = vperm.xlu1 %2757, %v2911_v7   ;;  %v1119_v37 = vmul.f32 1.442695, %v1117_v27  ;;  %v1048_v15 = vsub.f32 %v3590_v35, %v1046_v20  ;;  %v4083_v20 = vld [vmem:[#allocation19_spill] sm:$0xff] }
 0x341   :  { %v1043_v14 = vpop.xlane.xlu0 %1042 }
 0x342   :  { %2918 = vpow2.f32 %v1119_v37  ;;  %v1047_v25 = vsub.f32 %v3588_v26, %v1043_v14  ;;  %v1051_v30 = vmul.f32 1.442695, %v1048_v15 }
 0x344   :  { %2758 = vset.pattern.permute.xlu1 %v3082_v17  ;;  %v1049_v19 = vmul.f32 1.442695, %v1047_v25 }
 0x345   :  { %833 = vperm.xlu1 %2758, %v3628_v8   ;;  %v1116_v22 = vpop.xlane.xlu0 %1115 }
 0x346   :  { %2920 = vpow2.f32 %v1049_v19  ;;  %v1118_v32 = vsub.f32 %v3590_v35, %v1116_v22  ;;  %v4084_v22 = vld [vmem:[#allocation23_spill] sm:$0xff] }
 0x348   :  { %v1121_v18 = vmul.f32 1.442695, %v1118_v32 }
 0x349   :  { %2759 = vset.pattern.permute.xlu1 %v3083_v31 }
 0x34a   :  { %845 = vperm.xlu1 %2759, %v3628_v8  }
 0x34c   :  { %v2919_v50 = vpop.eup %2918 }
 0x34e   :  { %2760 = vset.pattern.permute.xlu1 %v4079_v39 }
 0x350   :  { %v3657_v43 = vpop.eup %2920 }
 0x351   :  { %v1053_v24 = vsel %vm799_vm13, %v3657_v43, 0.0 }
 0x35a   :  { %816 = vadd.xlane.f32.xlu0 %v815_v34  ;;  %v4081_v34 = vld [vmem:[#allocation15_spill] sm:$0xff] }
 0x35d   :  { %v1353_v26 = vpop.xlane.xlu1 %1352  ;;  %v1283_v46 = vpop.xlane.xlu0 %1282 }
 0x35e   :  { %v1357_v45 = vsub.f32 %v3601_v0, %v1353_v26  ;;  %v1287_v49 = vsub.f32 %v3601_v0, %v1283_v46 }
 0x360   :  { %v1359_v55 = vmul.f32 1.442695, %v1357_v45  ;;  %v1289_v16 = vmul.f32 1.442695, %v1287_v49 }
 0x361   :  { %v1356_v41 = vpop.xlane.xlu0 %1355 }
 0x362   :  { %2922 = vpow2.f32 %v1359_v55  ;;  %v1358_v42 = vsub.f32 %v3603_v38, %v1356_v41 }
 0x363   :  { %2924 = vpow2.f32 %v1121_v18 }
 0x364   :  { %2926 = vpow2.f32 %v1051_v30  ;;  %v1361_v48 = vmul.f32 1.442695, %v1358_v42 }
 0x365   :  { %2928 = vpow2.f32 %v1289_v16  ;;  %v1286_v59 = vpop.xlane.xlu0 %1285 }
 0x366   :  { %2930 = vpow2.f32 %v1361_v48  ;;  %v1288_v2 = vsub.f32 %v3603_v38, %v1286_v59 }
 0x368   :  { %v1291_v5 = vmul.f32 1.442695, %v1288_v2 }
 0x36a   :  { %2932 = vpow2.f32 %v1291_v5  ;;  %v4087_v5 = vld [vmem:[#allocation17_spill] sm:$0xff] }
 0x36c   :  { %v3669_v40 = vpop.eup %2922 }
 0x36d   :  { %v2925_v28 = vpop.eup %2924 }
 0x36e   :  { %813 = vadd.xlane.f32.xlu1 %v812_v36  ;;  %v3686_v35 = vpop.eup %2926 }
 0x36f   :  { %v3692_v29 = vpop.eup %2928  ;;  %v1056_v60 = vsel %vm799_vm13, %v3686_v35, 0.0 }
 0x370   :  { %1162 = vperm.xlu0 %2767, %v2919_v50   ;;  %v1293_v33 = vsel %vm799_vm13, %v3692_v29, 0.0  ;;  %v2931_v57 = vpop.eup %2930 }
 0x374   :  { %2777 = vset.pattern.permute.xlu0 %v3077_v21  ;;  %v3735_v36 = vpop.eup %2932 }
 0x375   :  { %v1296_v45 = vsel %vm799_vm13, %v3735_v36, 0.0 }
 0x37d   :  { %v1593_v0 = vpop.xlane.xlu1 %1592 }
 0x37e   :  { %v1597_v63 = vsub.f32 %v3613_v51, %v1593_v0 }
 0x37f   :  { %827 = vperm.xlu1 %2760, %v3645_v44   ;;  %v1596_v1 = vpop.xlane.xlu0 %1595 }
 0x380   :  { %v1599_v25 = vmul.f32 1.442695, %v1597_v63  ;;  %v1598_v59 = vsub.f32 %v3615_v53, %v1596_v1  ;;  %v4088_v63 = vld [vmem:[#allocation21_spill] sm:$0xff] }
 0x381   :  { %v3698_v47 = vpop.xlane.xlu1 %1522 }
 0x382   :  { %2934 = vpow2.f32 %v1599_v25  ;;  %v1601_v25 = vmul.f32 1.442695, %v1598_v59 }
 0x383   :  { %2762 = vset.pattern.permute.xlu1 %v3079_v61  ;;  %v3717_v4 = vpop.xlane.xlu0 %1525 }
 0x384   :  { %914 = vperm.xlu1 %2762, %v2915_v9   ;;  %2936 = vpow2.f32 %v1601_v25 }
 0x388   :  { %2763 = vset.pattern.permute.xlu1 %v3081_v11 }
 0x389   :  { %926 = vperm.xlu1 %2763, %v2915_v9   ;;  %v4080_v9 = vld [vmem:[#allocation14_spill] sm:$0xff] }
 0x38a   :  { %v178_v12 = vsub.s32 2, %v4080_v9 }
 0x38c   :  { %v179_v38 = vrot.slane %v4081_v34, %v178_v12  ;;  %v2935_v42 = vpop.eup %2934 }
 0x38d   :  { %1125 = vrot.lane.b32.xlu1 %v2919_v50, %s3078_s2 }
 0x38e   :  { %2765 = vset.pattern.permute.xlu1 %v3077_v21  ;;  %v3749_v32 = vadd.f32 %v4084_v22, %v179_v38  ;;  %v3770_v9 = vadd.f32 %v4087_v5, %v179_v38 }
 0x38f   :  { %1054 = vadd.xlane.f32.xlu0 %v1053_v24  ;;  %v3742_v24 = vadd.f32 %v4083_v20, %v179_v38  ;;  %v4089_v20 = vld [vmem:[#allocation20_spill] sm:$0xff] }
 0x391   :  { %1140 = vperm.xlu1 %2765, %v2919_v50  }
 0x395   :  { %2766 = vset.pattern.permute.xlu1 %v3079_v61 }
 0x396   :  { %1150 = vperm.xlu1 %2766, %v2919_v50  }
 0x39a   :  { %2768 = vset.pattern.permute.xlu1 %v3080_v10 }
 0x39b   :  { %1174 = vperm.xlu1 %2768, %v2919_v50   ;;  %v4082_v50 = vld [vmem:[#allocation18_spill] sm:$0xff] }
 0x39c   :  { %v3738_v14 = vadd.f32 %v4082_v50, %v179_v38 }
 0x39f   :  { %2769 = vset.pattern.permute.xlu1 %v4079_v39  ;;  %v3700_v52 = vpop.permute.xlu1 %885 }
 0x3a0   :  { %1063 = vperm.xlu1 %2769, %v3657_v43  }
 0x3a4   :  { %2770 = vset.pattern.permute.xlu1 %v3082_v17 }
 0x3a5   :  { %1365 = vrot.lane.b32.xlu0 %v3669_v40, %s3078_s2  ;;  %1074 = vperm.xlu1 %2770, %v3657_v43  }
 0x3a9   :  { %1380 = vperm.xlu0 %2777, %v3669_v40   ;;  %1127 = vrot.lane.b32.xlu1 %v2925_v28, %s3078_s2 }
 0x3aa   :  { %2771 = vset.pattern.permute.xlu1 %v3077_v21 }
 0x3ad   :  { %2779 = vset.pattern.permute.xlu0 %v3081_v11  ;;  %1144 = vperm.xlu1 %2771, %v2925_v28   ;;  %v3719_v6 = vpop.permute.xlu0 %822 }
 0x3ae   :  { %1402 = vperm.xlu0 %2779, %v3669_v40  }
 0x3b0   :  { %v3702_v54 = vpop.permute.xlu1 %900 }
 0x3b1   :  { %2772 = vset.pattern.permute.xlu1 %v3079_v61  ;;  %v3727_v23 = vpop.permute.xlu0 %887 }
 0x3b2   :  { %1154 = vperm.xlu1 %2772, %v2925_v28   ;;  %2782 = vset.pattern.permute.xlu0 %v3079_v61 }
 0x3b5   :  { %v3704_v56 = vpop.permute.xlu1 %910  ;;  %v905_v37 = vpop.permute.xlu0 %904 }
 0x3b6   :  { %2773 = vset.pattern.permute.xlu1 %v3081_v11  ;;  %v908_v55 = vmul.f32 %v905_v37, %v3742_v24  ;;  %v3773_v37 = vadd.f32 %v4088_v63, %v179_v38 }
 0x3b7   :  { %1166 = vperm.xlu1 %2773, %v2925_v28  }
 0x3ba   :  { %v3706_v58 = vpop.permute.xlu1 %922  ;;  %v939_v18 = vpop.permute.xlu0 %938 }
 0x3bb   :  { %2774 = vset.pattern.permute.xlu1 %v3080_v10 }
 0x3bc   :  { %1178 = vperm.xlu1 %2774, %v2925_v28   ;;  %v4085_v28 = vld [vmem:[#allocation22_spill] sm:$0xff] }
 0x3bd   :  { %v3753_v15 = vadd.f32 %v4085_v28, %v179_v38 }
 0x3bf   :  { %v3711_v62 = vpop.permute.xlu1 %934  ;;  %v942_v49 = vmul.f32 %v939_v18, %v3753_v15 }
 0x3c0   :  { %2775 = vset.pattern.permute.xlu1 %v4079_v39 }
 0x3c1   :  { %1068 = vperm.xlu1 %2775, %v3686_v35  }
 0x3c4   :  { %v3715_v3 = vpop.permute.xlu1 %833 }
 0x3c5   :  { %2776 = vset.pattern.permute.xlu1 %v3082_v17 }
 0x3c6   :  { %1078 = vperm.xlu1 %2776, %v3686_v35  }
 0x3c9   :  { %v3721_v7 = vpop.permute.xlu1 %845 }
 0x3ca   :  { %2778 = vset.pattern.permute.xlu1 %v3079_v61 }
 0x3cd   :  { %1294 = vadd.xlane.f32.xlu0 %v1293_v33 }
 0x3e3   :  { %1394 = vperm.xlu0 %2782, %v2931_v57  }
 0x3e7   :  { %2784 = vset.pattern.permute.xlu0 %v3080_v10  ;;  %v3762_v48 = vpop.xlane.xlu0 %816 }
 0x3e8   :  { %1418 = vperm.xlu0 %2784, %v2931_v57  }
 0x3ea   :  { %1057 = vadd.xlane.f32.xlu1 %v1056_v60  ;;  %v4086_v60 = vld [vmem:[#allocation16_spill] sm:$0xff] }
 0x3eb   :  { %v3767_v2 = vadd.f32 %v4086_v60, %v179_v38 }
 0x3ec   :  { %2786 = vset.pattern.permute.xlu0 %v3079_v61 }
 0x3ef   :  { %v1163_v12 = vpop.permute.xlu0 %1162 }
 0x3f0   :  { %v1169_v1 = vmul.f32 %v1163_v12, %v3773_v37 }
 0x3fb   :  { %1390 = vperm.xlu1 %2778, %v3669_v40   ;;  %v3725_v13 = vpop.xlane.xlu1 %813 }
 0x3ff   :  { %2780 = vset.pattern.permute.xlu1 %v3080_v10  ;;  %v3732_v27 = vpop.permute.xlu1 %827 }
 0x400   :  { %1414 = vperm.xlu1 %2780, %v3669_v40  }
 0x403   :  { %v915_v19 = vpop.permute.xlu1 %914 }
 0x404   :  { %1367 = vrot.lane.b32.xlu1 %v2931_v57, %s3078_s2  ;;  %v918_v26 = vmul.f32 %v915_v19, %v3738_v14 }
 0x405   :  { %2781 = vset.pattern.permute.xlu1 %v3077_v21 }
 0x406   :  { %v920_v30 = vadd.f32 %v918_v26, %v908_v55  ;;  %v3780_v26 = vadd.f32 %v4089_v20, %v179_v38 }
 0x407   :  { %1297 = vadd.xlane.f32.xlu0 %v1296_v45 }
 0x408   :  { %1384 = vperm.xlu1 %2781, %v2931_v57   ;;  %v927_v40 = vpop.permute.xlu1 %926 }
 0x409   :  { %v930_v46 = vmul.f32 %v927_v40, %v3749_v32 }
 0x40b   :  { %v932_v16 = vadd.f32 %v930_v46, %v920_v30  ;;  %v2937_v30 = vpop.eup %2936 }
 0x40c   :  { %2783 = vset.pattern.permute.xlu1 %v3081_v11  ;;  %v3758_v0 = vpop.permute.xlu1 %1125 }
 0x40d   :  { %v3760_v33 = vadd.f32 %v942_v49, %v932_v16  ;;  %1406 = vperm.xlu1 %2783, %v2931_v57  }
 0x410   :  { %v1141_v41 = vpop.permute.xlu1 %1140 }
 0x411   :  { %2785 = vset.pattern.permute.xlu1 %v3077_v21  ;;  %v1147_v57 = vmul.f32 %v1141_v41, %v3770_v9  ;;  %v1527_v41 = vsub.f32 %v3613_v51, %v3698_v47 }
 0x412   :  { %1620 = vperm.xlu1 %2785, %v2935_v42  }
 0x413   :  { %v1529_v60 = vmul.f32 1.442695, %v1527_v41  ;;  %v3084_v41 = vmov 3  }
 0x415   :  { %v1151_v34 = vpop.permute.xlu1 %1150  ;;  %2938 = vpow2.f32 %v1529_v60 }
 0x416   :  { %v1157_v50 = vmul.f32 %v1151_v34, %v3767_v2  ;;  %2787 = vset.pattern.permute.xlu1 %v3081_v11 }
 0x417   :  { %1642 = vperm.xlu1 %2787, %v2935_v42  }
 0x418   :  { %v1159_v19 = vadd.f32 %v1157_v50, %v1147_v57 }
 0x41a   :  { %v1171_v45 = vadd.f32 %v1169_v1, %v1159_v19  ;;  %v1175_v22 = vpop.permute.xlu1 %1174 }
 0x41b   :  { %v1181_v55 = vmul.f32 %v1175_v22, %v3780_v26  ;;  %2788 = vset.pattern.permute.xlu1 %v3080_v10 }
 0x41c   :  { %1654 = vperm.xlu1 %2788, %v2935_v42  }
 0x41d   :  { %v3784_v18 = vadd.f32 %v1181_v55, %v1171_v45  ;;  %1605 = vrot.lane.b32.xlu0 %v2935_v42, %s3078_s2 }
 0x41f   :  { %v1064_v40 = vpop.permute.xlu1 %1063  ;;  %v3801_v25 = vpop.eup %2938 }
 0x420   :  { %2789 = vset.pattern.permute.xlu1 %v3083_v31  ;;  %v1071_v38 = vmul.f32 %v1064_v40, %v3770_v9 }
 0x421   :  { %1630 = vperm.xlu0 %2786, %v2935_v42   ;;  %v1528_v42 = vsub.f32 %v3615_v53, %v3717_v4  ;;  %v1533_v53 = vsel %vm799_vm13, %v3801_v25, 0.0 }
 0x423   :  { %v1531_v34 = vmul.f32 1.442695, %v1528_v42 }
 0x424   :  { %v1075_v28 = vpop.permute.xlu1 %1074 }
 0x425   :  { %2793 = vset.pattern.permute.xlu0 %v3081_v11  ;;  %v1081_v46 = vmul.f32 %v1075_v28, %v3767_v2  ;;  %2940 = vpow2.f32 %v1531_v34 }
 0x426   :  { %1646 = vperm.xlu0 %2793, %v2937_v30  }
 0x427   :  { %v3791_v49 = vadd.f32 %v1081_v46, %v1071_v38  ;;  %v894_v38 = vsel %vm799_vm13, %v3727_v23, 0.0  ;;  %v3827_v23 = vpop.xlane.xlu0 %1054 }
 0x428   :  { %v1128_v16 = vpop.permute.xlu1 %1127 }
 0x429   :  { %v1134_v46 = vsel %vm799_vm13, %v1128_v16, 0.0 }
 0x42a   :  { %2796 = vset.pattern.permute.xlu0 %v4079_v39 }
 0x42b   :  { %v1366_v16 = vpop.permute.xlu0 %1365 }
 0x42c   :  { %v1145_v59 = vpop.permute.xlu1 %1144 }
 0x42d   :  { %v1148_v11 = vmul.f32 %v1145_v59, %v3742_v24 }
 0x42f   :  { %v3808_v20 = vpop.eup %2940  ;;  %v1381_v59 = vpop.permute.xlu0 %1380 }
 0x430   :  { %v1536_v45 = vsel %vm799_vm13, %v3808_v20, 0.0 }
 0x431   :  { %v1155_v5 = vpop.permute.xlu1 %1154 }
 0x432   :  { %v1158_v12 = vmul.f32 %v1155_v5, %v3738_v14  ;;  %v1387_v5 = vmul.f32 %v1381_v59, %v3770_v9 }
 0x434   :  { %v1160_v63 = vadd.f32 %v1158_v12, %v1148_v11 }
 0x436   :  { %v1167_v57 = vpop.permute.xlu1 %1166 }
 0x437   :  { %v1170_v50 = vmul.f32 %v1167_v57, %v3749_v32 }
 0x439   :  { %v1172_v51 = vadd.f32 %v1170_v50, %v1160_v63 }
 0x43b   :  { %v1179_v47 = vpop.permute.xlu1 %1178 }
 0x43c   :  { %v1182_v1 = vmul.f32 %v1179_v47, %v3753_v15 }
 0x43e   :  { %v3804_v19 = vadd.f32 %v1182_v1, %v1172_v51 }
 0x440   :  { %1534 = vadd.xlane.f32.xlu1 %v1533_v53  ;;  %v1069_v4 = vpop.permute.xlu1 %1068 }
 0x441   :  { %v1072_v55 = vmul.f32 %v1069_v4, %v3742_v24 }
 0x445   :  { %1537 = vadd.xlane.f32.xlu0 %v1536_v45  ;;  %v1079_v22 = vpop.permute.xlu1 %1078 }
 0x446   :  { %v1082_v40 = vmul.f32 %v1079_v22, %v3738_v14 }
 0x448   :  { %v3814_v28 = vadd.f32 %v1082_v40, %v1072_v55 }
 0x449   :  { %895 = vadd.xlane.f32.xlu0 %v894_v38 }
 0x44d   :  { %1135 = vadd.xlane.f32.xlu0 %v1134_v46 }
 0x451   :  { %1607 = vrot.lane.b32.xlu1 %v2937_v30, %s3078_s2 }
 0x455   :  { %849 = vperm.xlu1 %2789, %v3645_v44  }
 0x459   :  { %1086 = vperm.xlu1 %2789, %v3657_v43  }
 0x45d   :  { %2790 = vset.pattern.permute.xlu1 %v3084_v41 }
 0x45e   :  { %857 = vperm.xlu1 %2790, %v3628_v8   ;;  %v1403_v8 = vpop.permute.xlu0 %1402 }
 0x45f   :  { %v1409_v11 = vmul.f32 %v1403_v8, %v3773_v37 }
 0x462   :  { %861 = vperm.xlu1 %2790, %v3645_v44   ;;  %v3838_v57 = vpop.xlane.xlu0 %1294 }
 0x466   :  { %1102 = vperm.xlu1 %2790, %v3686_v35   ;;  %v1395_v47 = vpop.permute.xlu0 %1394 }
 0x467   :  { %v1398_v53 = vmul.f32 %v1395_v47, %v3738_v14 }
 0x46a   :  { %2791 = vset.pattern.permute.xlu1 %v3077_v21  ;;  %v1419_v22 = vpop.permute.xlu0 %1418 }
 0x46b   :  { %1624 = vperm.xlu1 %2791, %v2937_v30   ;;  %v1422_v38 = vmul.f32 %v1419_v22, %v3753_v15 }
 0x46f   :  { %2792 = vset.pattern.permute.xlu1 %v3079_v61 }
 0x470   :  { %1634 = vperm.xlu1 %2792, %v2937_v30  }
 0x474   :  { %2794 = vset.pattern.permute.xlu1 %v3080_v10 }
 0x475   :  { %1658 = vperm.xlu1 %2794, %v2937_v30  }
 0x477   :  { %v3831_v60 = vpop.xlane.xlu1 %1057 }
 0x479   :  { %2795 = vset.pattern.permute.xlu1 %v4079_v39 }
 0x47b   :  { %v1391_v42 = vpop.permute.xlu1 %1390 }
 0x47c   :  { %v1397_v21 = vmul.f32 %v1391_v42, %v3767_v2 }
 0x47e   :  { %v1399_v12 = vadd.f32 %v1397_v21, %v1387_v5  ;;  %v891_v5 = vsel %vm799_vm13, %v3700_v52, 0.0  ;;  %v1131_v21 = vsel %vm799_vm13, %v3758_v0, 0.0 }
 0x47f   :  { %v1415_v61 = vpop.permute.xlu1 %1414 }
 0x480   :  { %v1411_v34 = vadd.f32 %v1409_v11, %v1399_v12  ;;  %v1421_v63 = vmul.f32 %v1415_v61, %v3780_v26  ;;  %v1371_v61 = vsel %vm799_vm13, %v1366_v16, 0.0 }
 0x482   :  { %v3840_v30 = vadd.f32 %v1421_v63, %v1411_v34 }
 0x483   :  { %v1368_v50 = vpop.permute.xlu1 %1367 }
 0x484   :  { %v1374_v51 = vsel %vm799_vm13, %v1368_v50, 0.0 }
 0x485   :  { %1375 = vadd.xlane.f32.xlu0 %v1374_v51 }
 0x487   :  { %v1385_v1 = vpop.permute.xlu1 %1384 }
 0x488   :  { %v1388_v4 = vmul.f32 %v1385_v1, %v3742_v24 }
 0x48a   :  { %v1400_v45 = vadd.f32 %v1398_v53, %v1388_v4 }
 0x48c   :  { %v1407_v55 = vpop.permute.xlu1 %1406 }
 0x48d   :  { %v1410_v40 = vmul.f32 %v1407_v55, %v3749_v32 }
 0x48f   :  { %v1412_v46 = vadd.f32 %v1410_v40, %v1400_v45 }
 0x491   :  { %v3847_v59 = vadd.f32 %v1422_v38, %v1412_v46  ;;  %v1621_v8 = vpop.permute.xlu1 %1620  ;;  %v830_v38 = vmul.f32 %v3719_v6, %v3770_v9  ;;  %v852_v46 = vmul.f32 %v3721_v7, %v3773_v37 }
 0x492   :  { %v1627_v63 = vmul.f32 %v1621_v8, %v3770_v9 }
 0x494   :  { %v3849_v42 = vpop.xlane.xlu0 %1297 }
 0x496   :  { %v1643_v11 = vpop.permute.xlu1 %1642 }
 0x497   :  { %v1649_v52 = vmul.f32 %v1643_v11, %v3773_v37 }
 0x498   :  { %v1606_v12 = vpop.permute.xlu0 %1605 }
 0x499   :  { %892 = vadd.xlane.f32.xlu1 %v891_v5  ;;  %v1611_v1 = vsel %vm799_vm13, %v1606_v12, 0.0 }
 0x49b   :  { %1308 = vperm.xlu0 %2796, %v3735_v36   ;;  %v1655_v51 = vpop.permute.xlu1 %1654 }
 0x49c   :  { %v1661_v53 = vmul.f32 %v1655_v51, %v3780_v26 }
 0x49d   :  { %1132 = vadd.xlane.f32.xlu1 %v1131_v21 }
 0x4a0   :  { %v1631_v34 = vpop.permute.xlu0 %1630 }
 0x4a1   :  { %v1637_v50 = vmul.f32 %v1631_v34, %v3767_v2  ;;  %1372 = vadd.xlane.f32.xlu1 %v1371_v61 }
 0x4a3   :  { %v1639_v47 = vadd.f32 %v1637_v50, %v1627_v63 }
 0x4a5   :  { %v1651_v0 = vadd.f32 %v1649_v52, %v1639_v47  ;;  %1612 = vadd.xlane.f32.xlu1 %v1611_v1 }
 0x4a7   :  { %v3862_v4 = vadd.f32 %v1661_v53, %v1651_v0 }
 0x4b6   :  { %1303 = vperm.xlu1 %2795, %v3692_v29  }
 0x4ba   :  { %2797 = vset.pattern.permute.xlu1 %v3082_v17 }
 0x4bb   :  { %1314 = vperm.xlu1 %2797, %v3692_v29  }
 0x4bf   :  { %1318 = vperm.xlu1 %2797, %v3735_v36  }
 0x4c3   :  { %2799 = vset.pattern.permute.xlu1 %v4079_v39  ;;  %v840_v39 = vmul.f32 %v3715_v3, %v3767_v2 }
 0x4c4   :  { %1548 = vperm.xlu1 %2799, %v3808_v20  }
 0x4c5   :  { %v842_v5 = vadd.f32 %v840_v39, %v830_v38  ;;  %v2877_v39 = vld [vmem:[%s4034_s3 + $0x38] sm:$0xff]   ;;  %v929_v38 = vmul.f32 %v3706_v58, %v3773_v37 }
 0x4c7   :  { %v854_v12 = vadd.f32 %v852_v46, %v842_v5 }
 0x4c8   :  { %2801 = vset.pattern.permute.xlu1 %v3082_v17 }
 0x4c9   :  { %1558 = vperm.xlu1 %2801, %v3808_v20  }
 0x4cd   :  { %2802 = vset.pattern.permute.xlu1 %v3083_v31  ;;  %v3873_v16 = vpop.xlane.xlu1 %1534 }
 0x4ce   :  { %1326 = vperm.xlu1 %2802, %v3692_v29  }
 0x4d1   :  { %v1608_v45 = vpop.permute.xlu1 %1607 }
 0x4d2   :  { %1566 = vperm.xlu1 %2802, %v3801_v25   ;;  %v1614_v22 = vsel %vm799_vm13, %v1608_v45, 0.0 }
 0x4d3   :  { %1615 = vadd.xlane.f32.xlu0 %v1614_v22  ;;  %v917_v22 = vmul.f32 %v3704_v56, %v3767_v2  ;;  %v941_v56 = vmul.f32 %v3711_v62, %v3780_v26 }
 0x4d5   :  { %v3878_v55 = vpop.permute.xlu1 %849 }
 0x4d6   :  { %1570 = vperm.xlu1 %2802, %v3808_v20  }
 0x4d9   :  { %v1087_v40 = vpop.permute.xlu1 %1086 }
 0x4da   :  { %v1093_v8 = vmul.f32 %v1087_v40, %v3773_v37  ;;  %2804 = vset.pattern.permute.xlu1 %v3084_v41  ;;  %v907_v40 = vmul.f32 %v3702_v54, %v3770_v9 }
 0x4db   :  { %1342 = vperm.xlu1 %2804, %v3735_v36  }
 0x4dc   :  { %v3891_v21 = vadd.f32 %v1093_v8, %v3791_v49  ;;  %v1647_v49 = vpop.permute.xlu0 %1646  ;;  %v919_v5 = vadd.f32 %v917_v22, %v907_v40  ;;  %v831_v40 = vmul.f32 %v3732_v27, %v3742_v24 }
 0x4dd   :  { %v858_v11 = vpop.permute.xlu1 %857  ;;  %v1650_v52 = vmul.f32 %v1647_v49, %v3749_v32 }
 0x4de   :  { %v864_v3 = vmul.f32 %v858_v11, %v3780_v26  ;;  %v931_v11 = vadd.f32 %v929_v38, %v919_v5 }
 0x4df   :  { %1578 = vperm.xlu1 %2804, %v3801_v25  }
 0x4e0   :  { %v3895_v6 = vadd.f32 %v864_v3, %v854_v12 }
 0x4e1   :  { %v3897_v61 = vpop.permute.xlu1 %861 }
 0x4e5   :  { %v3899_v7 = vpop.permute.xlu1 %1102 }
 0x4e9   :  { %1543 = vperm.xlu0 %2796, %v3801_v25  }
 0x4ea   :  { %v1625_v34 = vpop.permute.xlu1 %1624 }
 0x4eb   :  { %v1628_v50 = vmul.f32 %v1625_v34, %v3742_v24  ;;  %v943_v34 = vadd.f32 %v941_v56, %v931_v11 }
 0x4ed   :  { %2798 = vset.pattern.permute.xlu0 %v3082_v17 }
 0x4ee   :  { %837 = vperm.xlu0 %2798, %v3645_v44   ;;  %v2870_v44 = vld [vmem:[%s4034_s3] sm:$0xff]  }
 0x4ef   :  { %v1635_v63 = vpop.permute.xlu1 %1634  ;;  %2708 = vmatprep.subr.bf16.mxu0 %v2870_v44 }
 0x4f0   :  { %v1638_v51 = vmul.f32 %v1635_v63, %v3738_v14  ;;  %2709 = vmatpush3.bf16.msra.mxu0 %v2870_v44 }
 0x4f2   :  { %v1640_v47 = vadd.f32 %v1638_v51, %v1628_v50  ;;  %1554 = vperm.xlu0 %2798, %v3801_v25   ;;  %v2871_v25 = vld [vmem:[%s4034_s3 + $0x8] sm:$0xff]  }
 0x4f3   :  { %2710 = vmatprep.subr.bf16.mxu0 %v2871_v25 }
 0x4f4   :  { %v1652_v1 = vadd.f32 %v1650_v52, %v1640_v47  ;;  %v1659_v53 = vpop.permute.xlu1 %1658  ;;  %2711 = vmatpush3.bf16.msra.mxu0 %v2871_v25 }
 0x4f5   :  { %v1662_v0 = vmul.f32 %v1659_v53, %v3753_v15 }
 0x4f6   :  { %2800 = vset.pattern.permute.xlu0 %v3083_v31  ;;  %v2872_v31 = vld [vmem:[%s4034_s3 + $0x10] sm:$0xff]  }
 0x4f7   :  { %v3910_v17 = vadd.f32 %v1662_v0, %v1652_v1  ;;  %1090 = vperm.xlu0 %2800, %v3686_v35   ;;  %2712 = vmatprep.subr.bf16.mxu0 %v2872_v31  ;;  %v2873_v35 = vld [vmem:[%s4034_s3 + $0x18] sm:$0xff]  }
 0x4f8   :  { %2713 = vmatpush3.bf16.msra.mxu0 %v2872_v31 }
 0x4f9   :  { %2714 = vmatprep.subr.bf16.mxu0 %v2873_v35 }
 0x4fb   :  { %1330 = vperm.xlu0 %2800, %v3735_v36   ;;  %v2875_v36 = vld [vmem:[%s4034_s3 + $0x28] sm:$0xff]  }
 0x4fc   :  { %2715 = vmatpush3.bf16.msra.mxu0 %v2873_v35 }
 0x4ff   :  { %2803 = vset.pattern.permute.xlu0 %v3084_v41 }
 0x500   :  { %1098 = vperm.xlu0 %2803, %v3657_v43   ;;  %v2874_v43 = vld [vmem:[%s4034_s3 + $0x20] sm:$0xff]  }
 0x501   :  { %2692 = vmatprep.subr.bf16.mxu1 %v2874_v43 }
 0x502   :  { %2693 = vmatpush3.bf16.msra.mxu1 %v2874_v43 }
 0x503   :  { %2694 = vmatprep.subr.bf16.mxu1 %v2875_v36 }
 0x504   :  { %1338 = vperm.xlu0 %2803, %v3692_v29   ;;  %v2876_v29 = vld [vmem:[%s4034_s3 + $0x30] sm:$0xff]  }
 0x506   :  { %2695 = vmatpush3.bf16.msra.mxu1 %v2875_v36 }
 0x507   :  { %2696 = vmatprep.subr.bf16.mxu1 %v2876_v29 }
 0x508   :  { %1582 = vperm.xlu0 %2803, %v3808_v20   ;;  %v3940_v20 = vpop.xlane.xlu0 %1537 }
 0x50a   :  { %2697 = vmatpush3.bf16.msra.mxu1 %v2876_v29 }
 0x50b   :  { %2698 = vmatprep.subr.bf16.mxu1 %v2877_v39 }
 0x50c   :  { %2805 = vset.pattern.permute.xlu0 %v3080_v10  ;;  %v896_v10 = vpop.xlane.xlu0 %895 }
 0x50d   :  { %2942 = vrcp.f32 %v896_v10 }
 0x50e   :  { %2699 = vmatpush3.bf16.msra.mxu1 %v2877_v39 }
 0x510   :  { %v1136_v41 = vpop.xlane.xlu0 %1135 }
 0x514   :  { %v1376_v46 = vpop.xlane.xlu0 %1375 }
 0x517   :  { %v2943_v3 = vpop.eup %2942 }
 0x518   :  { %v946_v63 = vmul.f32 %v2943_v3, %v3760_v33 }
 0x51a   :  { %v1309_v36 = vpop.permute.xlu0 %1308 }
 0x526   :  { %v893_v45 = vpop.xlane.xlu1 %892 }
 0x527   :  { %2944 = vrcp.f32 %v893_v45 }
 0x528   :  { %2946 = vrcp.f32 %v1136_v41 }
 0x52a   :  { %v1133_v8 = vpop.xlane.xlu1 %1132 }
 0x52b   :  { %2948 = vrcp.f32 %v1133_v8  ;;  %v853_v8 = vmul.f32 %v3878_v55, %v3749_v32 }
 0x52c   :  { %2950 = vrcp.f32 %v1376_v46 }
 0x52e   :  { %v1373_v12 = vpop.xlane.xlu1 %1372 }
 0x52f   :  { %2952 = vrcp.f32 %v1373_v12 }
 0x531   :  { %v2945_v49 = vpop.eup %2944 }
 0x532   :  { %v945_v54 = vmul.f32 %v2945_v49, %v943_v34  ;;  %v2947_v58 = vpop.eup %2946  ;;  %v1613_v33 = vpop.xlane.xlu1 %1612 }
 0x533   :  { %v1186_v47 = vmul.f32 %v2947_v58, %v3804_v19  ;;  %2954 = vrcp.f32 %v1613_v33 }
 0x534   :  { %v1687_v50 = vpack.c.bf16 %v946_v63, %v945_v54 }
 0x535   :  { %v2949_v51 = vpop.eup %2948 }
 0x536   :  { %1695 = vrot.lane.b32.xlu1 %v1687_v50, %s3069_s15  ;;  %v1185_v52 = vmul.f32 %v2949_v51, %v3784_v18  ;;  %v2951_v62 = vpop.eup %2950  ;;  %v1304_v31 = vpop.permute.xlu1 %1303  ;;  %v1312_v51 = vmul.f32 %v1309_v36, %v3742_v24 }
 0x537   :  { %v1426_v44 = vmul.f32 %v2951_v62, %v3847_v59 }
 0x538   :  { %v1688_v1 = vpack.c.bf16 %v1186_v47, %v1185_v52 }
 0x539   :  { %v2953_v53 = vpop.eup %2952 }
 0x53a   :  { %1697 = vrot.lane.b32.xlu0 %v1688_v1, %s3069_s15  ;;  %v1425_v0 = vmul.f32 %v2953_v53, %v3840_v30  ;;  %v1315_v35 = vpop.permute.xlu1 %1314  ;;  %v1311_v53 = vmul.f32 %v1304_v31, %v3770_v9 }
 0x53c   :  { %v1689_v25 = vpack.c.bf16 %v1426_v44, %v1425_v0 }
 0x53d   :  { %v2955_v41 = vpop.eup %2954 }
 0x53e   :  { %1699 = vrot.lane.b32.xlu1 %v1689_v25, %s3069_s15  ;;  %v1319_v43 = vpop.permute.xlu1 %1318  ;;  %v1665_v45 = vmul.f32 %v2955_v41, %v3862_v4  ;;  %v865_v4 = vmul.f32 %v3897_v61, %v3753_v15 }
 0x53f   :  { %v1322_v63 = vmul.f32 %v1319_v43, %v3738_v14 }
 0x541   :  { %v1324_v62 = vadd.f32 %v1322_v63, %v1312_v51  ;;  %v2886_v63 = vld [vmem:[#allocation7 + $0x60] sm:$0xff]   ;;  %v2890_v51 = vld [vmem:[#allocation7 + $0x70] sm:$0xff]  }
 0x543   :  { %v3961_v18 = vpop.permute.xlu1 %1548 }
 0x544   :  { %v1552_v36 = vmul.f32 %v3961_v18, %v3742_v24 }
 0x548   :  { %v1559_v29 = vpop.permute.xlu1 %1558 }
 0x54d   :  { %v1327_v59 = vpop.permute.xlu1 %1326 }
 0x54e   :  { %v1333_v0 = vmul.f32 %v1327_v59, %v3773_v37 }
 0x560   :  { %v1616_v19 = vpop.xlane.xlu0 %1615 }
 0x561   :  { %2956 = vrcp.f32 %v1616_v19 }
 0x562   :  { %2958 = vrcp.f32 %v3762_v48  ;;  %v1567_v48 = vpop.permute.xlu1 %1566 }
 0x563   :  { %2960 = vrcp.f32 %v3725_v13 }
 0x564   :  { %2962 = vrcp.f32 %v3831_v60  ;;  %v1106_v60 = vmul.f32 %v3899_v7, %v3753_v15  ;;  %v1321_v7 = vmul.f32 %v1315_v35, %v3767_v2  ;;  %v1573_v35 = vmul.f32 %v1567_v48, %v3773_v37 }
 0x565   :  { %2964 = vrcp.f32 %v3827_v23 }
 0x566   :  { %v1571_v49 = vpop.permute.xlu1 %1570  ;;  %2966 = vrcp.f32 %v3838_v57 }
 0x567   :  { %2968 = vrcp.f32 %v3849_v42  ;;  %v1323_v42 = vadd.f32 %v1321_v7, %v1311_v53  ;;  %v1574_v19 = vmul.f32 %v1571_v49, %v3749_v32  ;;  %v2881_v49 = vld [vmem:[#allocation7 + $0x8] sm:$0xff]   ;;  %v2893_v7 = vld [vmem:[#allocation7 + $0x38] sm:$0xff]   ;;  %v2898_v53 = vld [vmem:[#allocation7 + $0xd0] sm:$0xff]  }
 0x568   :  { %v1544_v10 = vpop.permute.xlu0 %1543  ;;  %2970 = vrcp.f32 %v3873_v16 }
 0x569   :  { %v1551_v1 = vmul.f32 %v1544_v10, %v3770_v9  ;;  %2972 = vrcp.f32 %v3940_v20  ;;  %v1335_v16 = vadd.f32 %v1333_v0, %v1323_v42  ;;  %v2899_v0 = vld [vmem:[#allocation7 + $0x90] sm:$0xff]   ;;  %v2904_v42 = vld [vmem:[#allocation7 + $0xe8] sm:$0xff]  }
 0x56b   :  { %v2957_v30 = vpop.eup %2956 }
 0x56c   :  { %v1666_v22 = vmul.f32 %v2957_v30, %v3910_v17  ;;  %v2959_v56 = vpop.eup %2958 }
 0x56d   :  { %v838_v39 = vpop.permute.xlu0 %837  ;;  %v2961_v27 = vpop.eup %2960 }
 0x56e   :  { %v841_v38 = vmul.f32 %v838_v39, %v3738_v14  ;;  %v1690_v46 = vpack.c.bf16 %v1666_v22, %v1665_v45  ;;  %v868_v12 = vmul.f32 %v2961_v27, %v3895_v6  ;;  %v2963_v50 = vpop.eup %2962 }
 0x56f   :  { %v2965_v31 = vpop.eup %2964 }
 0x570   :  { %v843_v5 = vadd.f32 %v841_v38, %v831_v40  ;;  %1701 = vrot.lane.b32.xlu0 %v1690_v46, %s3069_s15  ;;  %v2967_v37 = vpop.eup %2966 }
 0x571   :  { %v1555_v13 = vpop.permute.xlu0 %1554  ;;  %v2969_v39 = vpop.eup %2968 }
 0x572   :  { %v855_v17 = vadd.f32 %v853_v8, %v843_v5  ;;  %v1561_v52 = vmul.f32 %v1555_v13, %v3767_v2  ;;  %v1562_v2 = vmul.f32 %v1559_v29, %v3738_v14  ;;  %v2971_v8 = vpop.eup %2970 }
 0x573   :  { %v2973_v13 = vpop.eup %2972 }
 0x574   :  { %v867_v11 = vadd.f32 %v865_v4, %v855_v17  ;;  %v1563_v44 = vadd.f32 %v1561_v52, %v1551_v1  ;;  %v1564_v29 = vadd.f32 %v1562_v2, %v1552_v36  ;;  %v2891_v52 = vld [vmem:[#allocation7 + $0x30] sm:$0xff]   ;;  %v2897_v1 = vld [vmem:[#allocation7 + $0x88] sm:$0xff]  }
 0x575   :  { %v2905_v2 = vld [vmem:[#allocation7 + $0xa8] sm:$0xff]  }
 0x576   :  { %v869_v3 = vmul.f32 %v2959_v56, %v867_v11  ;;  %v1091_v34 = vpop.permute.xlu0 %1090  ;;  %v1575_v30 = vadd.f32 %v1573_v35, %v1563_v44  ;;  %v1576_v40 = vadd.f32 %v1574_v19, %v1564_v29  ;;  %v2901_v44 = vld [vmem:[#allocation7 + $0x98] sm:$0xff]   ;;  %v2906_v35 = vld [vmem:[#allocation7 + $0xf0] sm:$0xff]  }
 0x577   :  { %v1094_v55 = vmul.f32 %v1091_v34, %v3749_v32  ;;  %v2880_v34 = vld [vmem:[#allocation7 + $0x48] sm:$0xff]  }
 0x578   :  { %v1683_v54 = vpack.c.bf16 %v869_v3, %v868_v12  ;;  %v2878_v12 = vld [vmem:[#allocation7 + $0x40] sm:$0xff]  }
 0x579   :  { %v1096_v61 = vadd.f32 %v1094_v55, %v3814_v28  ;;  %v1343_v28 = vpop.permute.xlu1 %1342  ;;  %v2879_v3 = vld [vmem:[#allocation7] sm:$0xff]   ;;  %2624 = vmatprep.subr.bf16.mxu1 %v2878_v12  ;;  %v2882_v55 = vld [vmem:[#allocation7 + $0x50] sm:$0xff]  }
 0x57a   :  { %v1331_v58 = vpop.permute.xlu0 %1330  ;;  %2716 = vmatprep.mubr.msk.bf16.mxu0 %vm1727_vm14, %v1683_v54  ;;  %v1346_v43 = vmul.f32 %v1343_v28, %v3753_v15  ;;  %v2883_v54 = vld [vmem:[#allocation7 + $0x10] sm:$0xff]   ;;  %v2894_v28 = vld [vmem:[#allocation7 + $0xc0] sm:$0xff]  }
 0x57b   :  { %v1108_v6 = vadd.f32 %v1106_v60, %v1096_v61  ;;  %v1334_v23 = vmul.f32 %v1331_v58, %v3749_v32  ;;  %v2884_v60 = vld [vmem:[#allocation7 + $0x58] sm:$0xff]   ;;  %v2887_v58 = vld [vmem:[#allocation7 + $0x20] sm:$0xff]   ;;  %2646 = vmatprep.subr.bf16.mxu0 %v2894_v28 }
 0x57c   :  { %v2885_v61 = vld [vmem:[#allocation7 + $0x18] sm:$0xff]  }
 0x57d   :  { %v1110_v47 = vmul.f32 %v2963_v50, %v1108_v6  ;;  %v1336_v25 = vadd.f32 %v1334_v23, %v1324_v62  ;;  %v1579_v10 = vpop.permute.xlu1 %1578  ;;  %v2888_v6 = vld [vmem:[#allocation7 + $0x68] sm:$0xff]   ;;  %v2892_v23 = vld [vmem:[#allocation7 + $0x78] sm:$0xff]  }
 0x57e   :  { %v1585_v45 = vmul.f32 %v1579_v10, %v3780_v26  ;;  %v2889_v50 = vld [vmem:[#allocation7 + $0x28] sm:$0xff]  }
 0x57f   :  { %v1099_v57 = vpop.permute.xlu0 %1098  ;;  %v1348_v20 = vadd.f32 %v1346_v43, %v1336_v25  ;;  %v2896_v62 = vld [vmem:[#allocation7 + $0xc8] sm:$0xff]   ;;  %v2902_v25 = vld [vmem:[#allocation7 + $0xe0] sm:$0xff]   ;;  %v2907_v43 = vld [vmem:[#allocation7 + $0xb0] sm:$0xff]  }
 0x580   :  { %v1105_v33 = vmul.f32 %v1099_v57, %v3780_v26  ;;  %v1587_v24 = vadd.f32 %v1585_v45, %v1575_v30  ;;  %v2900_v57 = vld [vmem:[#allocation7 + $0xd8] sm:$0xff]   ;;  %v2386_v45 = vld [vmem:[%s4035_s4] ss:$0 sm:$0xff] }
 0x581   :  { %v1350_v18 = vmul.f32 %v2969_v39, %v1348_v20 }
 0x582   :  { %v1107_v9 = vadd.f32 %v1105_v33, %v3891_v21  ;;  %v1589_v4 = vmul.f32 %v2971_v8, %v1587_v24  ;;  %v2903_v33 = vld [vmem:[#allocation7 + $0xa0] sm:$0xff]  }
 0x583   :  { %v1339_v41 = vpop.permute.xlu0 %1338 }
 0x584   :  { %v1109_v59 = vmul.f32 %v2965_v31, %v1107_v9  ;;  %v1345_v14 = vmul.f32 %v1339_v41, %v3780_v26  ;;  %v2908_v9 = vld [vmem:[#allocation7 + $0xf8] sm:$0xff]  }
 0x585   :  { %v2909_v31 = vld [vmem:[#allocation7 + $0xb8] sm:$0xff]  }
 0x586   :  { %v1684_v22 = vpack.c.bf16 %v1110_v47, %v1109_v59  ;;  %v1347_v21 = vadd.f32 %v1345_v14, %v1335_v16  ;;  %v2895_v47 = vld [vmem:[#allocation7 + $0x80] sm:$0xff]  }
 0x587   :  { %v1583_v38 = vpop.permute.xlu0 %1582 }
 0x588   :  { %v1349_v46 = vmul.f32 %v2967_v37, %v1347_v21  ;;  %v1586_v32 = vmul.f32 %v1583_v38, %v3753_v15  ;;  %2717 = vmatmul.mubr.msk.bf16.vlgmr.msra.gmra.mrb[32].mxu0 %vm1727_vm14, %v1684_v22 }
 0x589   :  { %2647 = vmatpush3.bf16.msra.mxu0 %v2895_v47 }
 0x58a   :  { %v1685_v5 = vpack.c.bf16 %v1350_v18, %v1349_v46  ;;  %v1588_v48 = vadd.f32 %v1586_v32, %v1576_v40  ;;  %2648 = vmatprep.subr.bf16.mxu0 %v2896_v62 }
 0x58c   :  { %v1590_v17 = vmul.f32 %v2973_v13, %v1588_v48  ;;  %2720 = vmatprep.mubr.msk.bf16.mxu0 %vm1727_vm14, %v1685_v5 }
 0x58d   :  { %2649 = vmatpush3.bf16.msra.mxu0 %v2897_v1 }
 0x58e   :  { %v1686_v26 = vpack.c.bf16 %v1590_v17, %v1589_v4  ;;  %2650 = vmatprep.subr.bf16.mxu0 %v2898_v53 }
 0x590   :  { %2721 = vmatmul.mubr.msk.bf16.gmra.mrb[36].mxu0 %vm1727_vm14, %v1686_v26 }
 0x591   :  { %2651 = vmatpush3.bf16.msra.mxu0 %v2899_v0 }
 0x592   :  { %2652 = vmatprep.subr.bf16.mxu0 %v2900_v57 }
 0x595   :  { %2653 = vmatpush3.bf16.msra.mxu0 %v2901_v44 }
 0x596   :  { %2654 = vmatprep.subr.bf16.mxu0 %v2902_v25 }
 0x599   :  { %2655 = vmatpush3.bf16.msra.mxu0 %v2903_v33 }
 0x59a   :  { %2656 = vmatprep.subr.bf16.mxu0 %v2904_v42 }
 0x59d   :  { %2657 = vmatpush3.bf16.msra.mxu0 %v2905_v2 }
 0x59e   :  { %2658 = vmatprep.subr.bf16.mxu0 %v2906_v35 }
 0x5a1   :  { %2659 = vmatpush3.bf16.msra.mxu0 %v2907_v43 }
 0x5a2   :  { %2660 = vmatprep.subr.bf16.mxu0 %v2908_v9 }
 0x5a5   :  { %2661 = vmatpush3.bf16.msra.mxu0 %v2909_v31 }
 0x5a8   :  { %v1696_v56 = vpop.permute.xlu1 %1695 }
 0x5a9   :  { %2700 = vmatprep.mubr.msk.bf16.mxu1 %vm1727_vm14, %v1696_v56 }
 0x5ac   :  { %v1698_v11 = vpop.permute.xlu0 %1697 }
 0x5ad   :  { %2701 = vmatmul.mubr.msk.bf16.vlgmr.msra.gmra.mrb[24].mxu1 %vm1727_vm14, %v1698_v11 }
 0x5ae   :  { %2625 = vmatpush3.bf16.msra.mxu1 %v2879_v3 }
 0x5af   :  { %2626 = vmatprep.subr.bf16.mxu1 %v2880_v34 }
 0x5b0   :  { %v1700_v15 = vpop.permute.xlu1 %1699 }
 0x5b1   :  { %2704 = vmatprep.mubr.msk.bf16.mxu1 %vm1727_vm14, %v1700_v15 }
 0x5b2   :  { %2627 = vmatpush3.bf16.msra.mxu1 %v2881_v49 }
 0x5b3   :  { %2628 = vmatprep.subr.bf16.mxu1 %v2882_v55 }
 0x5b6   :  { %2629 = vmatpush3.bf16.msra.mxu1 %v2883_v54 }
 0x5b7   :  { %2630 = vmatprep.subr.bf16.mxu1 %v2884_v60 }
 0x5ba   :  { %2631 = vmatpush3.bf16.msra.mxu1 %v2885_v61 }
 0x5bb   :  { %2632 = vmatprep.subr.bf16.mxu1 %v2886_v63 }
 0x5be   :  { %2633 = vmatpush3.bf16.msra.mxu1 %v2887_v58 }
 0x5bf   :  { %2634 = vmatprep.subr.bf16.mxu1 %v2888_v6 }
 0x5c2   :  { %2635 = vmatpush3.bf16.msra.mxu1 %v2889_v50  ;;  %v2387_v50 = vld [vmem:[%s4038_s7] ss:$0 sm:$0xff] }
 0x5c3   :  { %2636 = vmatprep.subr.bf16.mxu1 %v2890_v51 }
 0x5c6   :  { %2637 = vmatpush3.bf16.msra.mxu1 %v2891_v52 }
 0x5c7   :  { %2638 = vmatprep.subr.bf16.mxu1 %v2892_v23 }
 0x5ca   :  { %2639 = vmatpush3.bf16.msra.mxu1 %v2893_v7 }
 0x5e2   :  { %v1702_v27 = vpop.permute.xlu0 %1701 }
 0x5e3   :  { %2705 = vmatmul.mubr.msk.bf16.gmra.mrb[28].mxu1 %vm1727_vm14, %v1702_v27 }
 0x65b   :  { %v2718_v36 = vpop.f32.mrb[32].mxu0 }
 0x65c   :  { %v1875_v16 = vpop.f32.mrb[33].mxu0 }
 0x65d   :  { %v2719_v19 = vpop.f32.mrb[34].mxu0 }
 0x65e   :  { %v1878_v10 = vpop.f32.mrb[35].mxu0 }
 0x663   :  { %v2722_v41 = vpop.f32.mrb[36].mxu0 }
 0x664   :  { %v1891_v30 = vpop.f32.mrb[37].mxu0 }
 0x665   :  { %v2723_v20 = vpop.f32.mrb[38].mxu0 }
 0x666   :  { %v1894_v59 = vpop.f32.mrb[39].mxu0 }
 0x680   :  { %v2702_v14 = vpop.f32.mrb[24].mxu1 }
 0x681   :  { %v1884_v29 = vadd.f32 %v2718_v36, %v2702_v14  ;;  %v1774_v37 = vpop.f32.mrb[25].mxu1 }
 0x682   :  { %v1876_v22 = vadd.f32 %v1875_v16, %v1774_v37  ;;  %v2703_v21 = vpop.f32.mrb[26].mxu1 }
 0x683   :  { %v1887_v39 = vadd.f32 %v2719_v19, %v2703_v21  ;;  %v1777_v40 = vpop.f32.mrb[27].mxu1  ;;  %v1915_v24 = vadd.f32 %v2386_v45, %v1884_v29 }
 0x684   :  { %v1879_v38 = vadd.f32 %v1878_v10, %v1777_v40  ;;  %v1913_v46 = vadd.f32 %v2386_v45, %v1876_v22 }
 0x685   :  { %v1916_v18 = vadd.f32 %v2386_v45, %v1887_v39 }
 0x686   :  { %v1914_v32 = vadd.f32 %v2386_v45, %v1879_v38 }
 0x687   :  { %v1922_v8 = vpack.c.bf16 %v1916_v18, %v1915_v24 }
 0x688   :  { %v1921_v5 = vpack.c.bf16 %v1914_v32, %v1913_v46 }
 0x689   :  { %2220 = vmatprep.mubr.bf16.mxu1 %v1922_v8 }
 0x68a   :  { %2221 = vmatmul.mubr.bf16.vlgmr.msra.gmra.mrb[32].mxu1 %v1921_v5 }
 0x6b6   :  { %v2706_v48 = vpop.f32.mrb[28].mxu1 }
 0x6b7   :  { %v1900_v13 = vadd.f32 %v2722_v41, %v2706_v48  ;;  %v1790_v4 = vpop.f32.mrb[29].mxu1 }
 0x6b8   :  { %v1892_v17 = vadd.f32 %v1891_v30, %v1790_v4  ;;  %v2707_v26 = vpop.f32.mrb[30].mxu1 }
 0x6b9   :  { %v1903_v56 = vadd.f32 %v2723_v20, %v2707_v26  ;;  %v1793_v11 = vpop.f32.mrb[31].mxu1  ;;  %v1919_v27 = vadd.f32 %v2386_v45, %v1900_v13 }
 0x6ba   :  { %v1895_v15 = vadd.f32 %v1894_v59, %v1793_v11  ;;  %v1917_v3 = vadd.f32 %v2386_v45, %v1892_v17 }
 0x6bb   :  { %v1920_v12 = vadd.f32 %v2386_v45, %v1903_v56 }
 0x6bc   :  { %v1918_v34 = vadd.f32 %v2386_v45, %v1895_v15 }
 0x6bd   :  { %v1924_v49 = vpack.c.bf16 %v1920_v12, %v1919_v27 }
 0x6be   :  { %v1923_v55 = vpack.c.bf16 %v1918_v34, %v1917_v3 }
 0x6bf   :  { %2261 = vmatprep.mubr.bf16.mxu0 %v1924_v49 }
 0x6c0   :  { %2262 = vmatmul.mubr.bf16.vlgmr.msra.gmra.mrb[40].mxu0 %v1923_v55 }
 0x75d   :  { %v2640_v54 = vpop.f32.mrb[32].mxu1 }
 0x75e   :  { %v2641_v60 = vpop.f32.mrb[33].mxu1 }
 0x75f   :  { %v2642_v61 = vadd.f32 %v2641_v60, %v2640_v54  ;;  %v2643_v63 = vpop.f32.mrb[34].mxu1 }
 0x760   :  { %v2644_v58 = vpop.f32.mrb[35].mxu1 }
 0x761   :  { %v2645_v6 = vadd.f32 %v2644_v58, %v2643_v63  ;;  %v2223_v23 = vadd.f32 %v2642_v61, %v2387_v50 }
 0x763   :  { %v2226_v62 = vadd.f32 %v2645_v6, %v2387_v50 }
 0x793   :  { %v2662_v51 = vpop.f32.mrb[40].mxu0 }
 0x794   :  { %v2663_v52 = vpop.f32.mrb[41].mxu0 }
 0x795   :  { %v2664_v7 = vadd.f32 %v2663_v52, %v2662_v51  ;;  %v2665_v28 = vpop.f32.mrb[42].mxu0 }
 0x796   :  { %v2666_v47 = vpop.f32.mrb[43].mxu0 }
 0x797   :  { %v2264_v1 = vadd.f32 %v2664_v7, %v2223_v23  ;;  %v2667_v53 = vadd.f32 %v2666_v47, %v2665_v28 }
 0x799   :  { %2270 = vst [vmem:[#allocation8] sm:$0xff] %v2264_v1  ;;  %v2267_v0 = vadd.f32 %v2667_v53, %v2226_v62 }
 0x79b   :  { %2271 = vst [vmem:[#allocation8 + $0x8] sm:$0xff] %v2267_v0 }
 0x79c   :  { %3051 = shalt.err (!%p3048_p0)
}
 0x79d   :  { %s3052_s12 = scalar_lea.hbm %s4039_s8, 256 }
 0x79e   :  { %p3053_p1 = scmp.ne.s32.totalorder %s4039_s8, %s3052_s12  ;;  %p3056_p2 = scmp.lt.u32.totalorder %s3052_s12, %s4039_s8 }
 0x7a0   :  { %p3058_p3 = pnand %p3056_p2, %p3053_p1 }
 0x7a2   :  { %3061 = shalt.err (!%p3058_p3)
}
 0x7a3   :  { %s3086_s17 = smov 128   ;;  %s3087_s18 = smov 8  }
 0x7a4   :  { %2283 = dma.vmem_to_hbm [thread:$0]  %s2278_s9, 256, %s4039_s8, [#allocation4], %s3086_s17, %s3086_s17, %s3087_s18  }
 0x7a5   :  { %3066 = dma.done.wait [#allocation4], 256  }
 0x7a6   :  { %3067 = vsyncadd [#allocation4], 4294967040 }
 0x7a7   :  { %2287 = vsyncpa [#allocation3], 1 }
 0x7a8   :  { %2288 = vsyncpa [#allocation6], 1 }
 0x7a9   :  { %2289 = vsyncpa [#allocation4], 1 }

</bundles_post_ra>
